<compile_context>
chip_gen: v5e
topology: v5e:2x2
jax: 0.10.0
libtpu: 0.0.40
codegen_flags: <defaults>
</compile_context>

<pallas_src>
import jax
import jax.numpy as jnp
from jax import lax
from jax.experimental import pallas as pl
from jax.experimental.pallas import tpu as pltpu

# ---- static config (module hyper-parameters) --------------------------------
B = 8                         # batch (>= 2 grid steps at BATCHES_PER_STEP = 4)
C_IN = 32                     # in_channels
HIDDEN = 64                   # hidden_channels
NUM_HEADS = HIDDEN // 32      # default num_heads = hidden_channels // 32
CH = HIDDEN // NUM_HEADS      # channels per head
T = 64                        # sequence length
NUM_GROUPS = min(32, C_IN)
CPG = C_IN // NUM_GROUPS      # channels per group
EPS = 1e-6

# pack several batch elements along the lane axis: LANES = 256 fills the
# 256-wide MXU on v6e/v7x and keeps stores unmasked (multiple of 128 lanes).
BATCHES_PER_STEP = 4
LANES = BATCHES_PER_STEP * T

assert LANES % 128 == 0
assert C_IN % NUM_GROUPS == 0
assert HIDDEN % NUM_HEADS == 0
assert B % BATCHES_PER_STEP == 0

_CONTRACT_LANES = (((1,), (1,)), ((), ()))   # A (m, L) x B (n, L) -> (m, n)


def _dot(a, b):
    return jnp.dot(a, b, preferred_element_type=jnp.float32)


def _dot_lanes(a, b):
    # contract the lane (last) axis of BOTH operands -> no materialized .T
    return lax.dot_general(a, b, _CONTRACT_LANES,
                           preferred_element_type=jnp.float32)


def channel_attn_kernel(x_ref, sel_ref, gmap_ref, wqkv_ref, wo_ref, o_ref,
                        attn_ref):
    x = x_ref[...]                  # (C_IN, LANES) f32
    sel = sel_ref[...]              # (BATCHES_PER_STEP, LANES) 0/1 selector
    ones_row = jnp.ones((1, LANES), jnp.float32)

    # ---- GroupNorm, two-pass centered variance (MXU stat matmuls) -----------
    sum_x = _dot_lanes(x, sel)                    # (C_IN, BPS) per-(chan,batch)
    mu = _dot(gmap_ref[...], sum_x)               # (C_IN, BPS) group mean/chan
    mu_full = _dot(mu, sel)                       # (C_IN, LANES)
    xc = x - mu_full
    sum_c2 = _dot_lanes(xc * xc, sel)             # (C_IN, BPS)
    var = _dot(gmap_ref[...], sum_c2)             # (C_IN, BPS) centered var
    rstd = lax.rsqrt(var + EPS)
    rstd_full = _dot(rstd, sel)                   # (C_IN, LANES)
    hn = xc * rstd_full                           # gamma/beta folded into Wqkv

    # ---- fused, biased q/k/v 1x1 conv (single MXU matmul, bias via ones row) -
    hn_aug = jnp.concatenate([hn, ones_row], axis=0)     # (C_IN+1, LANES)
    qkv = _dot(wqkv_ref[...], hn_aug)                    # (3*HIDDEN, LANES)

    # ---- per-head channel attention; heads packed into the attn scratch ------
    for hd in range(NUM_HEADS):
        q_h = qkv[hd * CH:(hd + 1) * CH, :]
        k_h = qkv[HIDDEN + hd * CH:HIDDEN + (hd + 1) * CH, :]
        v_h = qkv[2 * HIDDEN + hd * CH:2 * HIDDEN + (hd + 1) * CH, :]

        # softmax over the per-head channel (sublane) axis; approx reciprocal
        # runs on the otherwise idle EUP slot.
        q_h = jnp.exp(q_h - jnp.max(q_h, axis=0, keepdims=True))
        q_h = q_h * pl.reciprocal(jnp.sum(q_h, axis=0, keepdims=True),
                                  approx=True)
        k_h = jnp.exp(k_h - jnp.max(k_h, axis=0, keepdims=True))
        k_h = k_h * pl.reciprocal(jnp.sum(k_h, axis=0, keepdims=True),
                                  approx=True)

        # per-batch attention via 0/1 lane masks: everything stays lane-dense.
        out_h = None
        for b in range(BATCHES_PER_STEP):
            m = sel[b:b + 1, :]                    # (1, LANES)
            w = _dot_lanes(q_h, k_h * m)           # (CH, CH), batch b only
            o_b = _dot(w, v_h * m)                 # (CH, LANES), batch-b cols
            out_h = o_b if out_h is None else out_h + o_b
        attn_ref[pl.ds(hd * CH, CH), :] = out_h    # 32-row aligned sublane store

    # ones row -> proj bias comes out of the single fused Wo matmul
    attn_ref[pl.ds(HIDDEN, 1), :] = ones_row

    # ---- single fused proj_out (+ bias) and residual, full-lane store --------
    proj = _dot(wo_ref[...], attn_ref[...])        # (C_IN, LANES)
    o_ref[...] = x + proj


def _fold_params(params):
    """Fold GroupNorm affine + all conv biases into two packed weights."""
    gamma = params["gamma"]                                    # (C_IN, 1)
    beta = params["beta"]                                      # (C_IN, 1)
    wqkv = jnp.concatenate([params["wq"], params["wk"], params["wv"]], axis=0)
    bqkv = jnp.concatenate([params["bq"], params["bk"], params["bv"]], axis=0)
    wqkv_f = wqkv * gamma.reshape(1, C_IN)                     # fold gamma
    bqkv_f = jnp.dot(wqkv, beta) + bqkv                        # fold beta
    wqkv_aug = jnp.concatenate([wqkv_f, bqkv_f], axis=1)       # (3H, C_IN+1)
    wo_aug = jnp.concatenate([params["wo"], params["bo"]], axis=1)  # (C, H+1)
    return wqkv_aug, wo_aug


def _lane_constants():
    # sel[b, j] = 1 iff lane j belongs to (local) batch b within a grid step
    sel = (jnp.arange(BATCHES_PER_STEP)[:, None]
           == (jnp.arange(LANES)[None, :] // T)).astype(jnp.float32)
    # group-pool matrix, pre-scaled by 1/(channels_per_group * T)
    gid = jnp.arange(C_IN) // CPG
    gmap = (gid[:, None] == gid[None, :]).astype(jnp.float32) / float(CPG * T)
    return sel, gmap


def _cost_estimate(steps):
    per_step_flops = (
        2 * 2 * C_IN * LANES * BATCHES_PER_STEP            # lane-contracted sums
        + 2 * 2 * C_IN * C_IN * BATCHES_PER_STEP           # group pooling
        + 2 * 2 * C_IN * BATCHES_PER_STEP * LANES          # stat broadcasts
        + 2 * 3 * HIDDEN * (C_IN + 1) * LANES              # fused qkv
        + NUM_HEADS * BATCHES_PER_STEP * 4 * CH * CH * LANES  # attention
        + 2 * C_IN * (HIDDEN + 1) * LANES                  # fused proj_out
    )
    per_step_trans = (2 * HIDDEN * LANES                   # exp for q and k
                      + C_IN * BATCHES_PER_STEP            # rsqrt
                      + 2 * NUM_HEADS * LANES)             # approx reciprocals
    per_step_bytes = 4 * (2 * C_IN * LANES                 # x in + out
                          + BATCHES_PER_STEP * LANES + C_IN * C_IN
                          + 3 * HIDDEN * (C_IN + 1) + C_IN * (HIDDEN + 1))
    return pl.CostEstimate(flops=steps * per_step_flops,
                           transcendentals=steps * per_step_trans,
                           bytes_accessed=steps * per_step_bytes)


def channel_attn_block_slab(x_slab, params):
    """Lane-dense entry point: x_slab is the (C_IN, B*T) slab.  In a real model
    keep this layout persistent across neighbouring ops to avoid any transpose
    round-trips around the kernel."""
    c, total = x_slab.shape
    assert c == C_IN and total % LANES == 0
    steps = total // LANES

    wqkv_aug, wo_aug = _fold_params(params)
    sel, gmap = _lane_constants()

    grid_spec = pltpu.PrefetchScalarGridSpec(
        num_scalar_prefetch=0,
        grid=(steps,),
        in_specs=[
            pl.BlockSpec((C_IN, LANES), lambda i: (0, i)),              # x slab
            pl.BlockSpec((BATCHES_PER_STEP, LANES), lambda i: (0, 0)),  # sel
            pl.BlockSpec((C_IN, C_IN), lambda i: (0, 0)),               # gmap
            pl.BlockSpec((3 * HIDDEN, C_IN + 1), lambda i: (0, 0)),     # Wqkv|b
            pl.BlockSpec((C_IN, HIDDEN + 1), lambda i: (0, 0)),         # Wo|bo
        ],
        out_specs=pl.BlockSpec((C_IN, LANES), lambda i: (0, i)),
        scratch_shapes=[pltpu.VMEM((HIDDEN + 1, LANES), jnp.float32)],
    )
    return pl.pallas_call(
        channel_attn_kernel,
        out_shape=jax.ShapeDtypeStruct((C_IN, total), jnp.float32),
        grid_spec=grid_spec,
        input_output_aliases={0: 0},       # residual output reuses x's buffer
        compiler_params=pltpu.CompilerParams(
            dimension_semantics=("parallel",)),
        cost_estimate=_cost_estimate(steps),
    )(x_slab, sel, gmap, wqkv_aug, wo_aug)


@jax.jit
def channel_attn_block(x, params):
    """x: (B, C_IN, T) float32. params: original module parameterization."""
    Bv, Cv, Tv = x.shape
    assert (Cv, Tv) == (C_IN, T) and Bv % BATCHES_PER_STEP == 0
    # lane-dense slab: (B, C, T) -> (C, B*T).  (Only needed at the boundary;
    # use channel_attn_block_slab directly when the layout already persists.)
    x_slab = jnp.transpose(x, (1, 0, 2)).reshape(C_IN, Bv * T)
    o_slab = channel_attn_block_slab(x_slab, params)
    return jnp.transpose(o_slab.reshape(C_IN, Bv, T), (1, 0, 2))


# ---- pure-JAX reference for verification ------------------------------------
def reference(x, p):
    Bv = x.shape[0]
    xr = x.reshape(Bv, NUM_GROUPS, -1)
    mu = jnp.mean(xr, axis=-1, keepdims=True)
    var = jnp.mean((xr - mu) ** 2, axis=-1, keepdims=True)
    h = ((xr - mu) / jnp.sqrt(var + EPS)).reshape(Bv, C_IN, T)
    h = h * p["gamma"][None, :, :] + p["beta"][None, :, :]

    q = jnp.einsum("hc,bct->bht", p["wq"], h) + p["bq"][None, :, :]
    k = jnp.einsum("hc,bct->bht", p["wk"], h) + p["bk"][None, :, :]
    v = jnp.einsum("hc,bct->bht", p["wv"], h) + p["bv"][None, :, :]

    qh = jax.nn.softmax(q.reshape(Bv, NUM_HEADS, CH, T), axis=2)
    kh = jax.nn.softmax(k.reshape(Bv, NUM_HEADS, CH, T), axis=2)
    vh = v.reshape(Bv, NUM_HEADS, CH, T)

    w = jnp.einsum("bnct,bndt->bncd", qh, kh)
    a = jnp.einsum("bncd,bndt->bnct", w, vh).reshape(Bv, HIDDEN, T)

    proj = jnp.einsum("ch,bht->bct", p["wo"], a) + p["bo"][None, :, :]
    return x + proj


def init_params(key):
    ks = jax.random.split(key, 10)
    scale_in = 1.0 / jnp.sqrt(C_IN)
    scale_hid = 1.0 / jnp.sqrt(HIDDEN)
    return {
        # non-trivial affine so the gamma/beta folding is actually exercised
        "gamma": 1.0 + 0.1 * jax.random.normal(ks[8], (C_IN, 1), jnp.float32),
        "beta": 0.1 * jax.random.normal(ks[9], (C_IN, 1), jnp.float32),
        "wq": jax.random.uniform(ks[0], (HIDDEN, C_IN), jnp.float32, -scale_in, scale_in),
        "bq": jax.random.uniform(ks[1], (HIDDEN, 1), jnp.float32, -scale_in, scale_in),
        "wk": jax.random.uniform(ks[2], (HIDDEN, C_IN), jnp.float32, -scale_in, scale_in),
        "bk": jax.random.uniform(ks[3], (HIDDEN, 1), jnp.float32, -scale_in, scale_in),
        "wv": jax.random.uniform(ks[4], (HIDDEN, C_IN), jnp.float32, -scale_in, scale_in),
        "bv": jax.random.uniform(ks[5], (HIDDEN, 1), jnp.float32, -scale_in, scale_in),
        "wo": jax.random.uniform(ks[6], (C_IN, HIDDEN), jnp.float32, -scale_hid, scale_hid),
        "bo": jax.random.uniform(ks[7], (C_IN, 1), jnp.float32, -scale_hid, scale_hid),
    }


if __name__ == "__main__":
    key = jax.random.PRNGKey(0)
    k_x, k_p = jax.random.split(key)
    x = jax.random.normal(k_x, (B, C_IN, T), jnp.float32)
    params = init_params(k_p)

    out = jax.block_until_ready(channel_attn_block(x, params))

    ref = reference(x, params)
    assert out.shape == (B, C_IN, T)
    max_err = float(jnp.max(jnp.abs(out - ref)))
    # tolerance 2e-3: accounts for the EUP approximate reciprocals in the
    # softmax denominators (everything else is exact f32 algebra).
    assert jnp.allclose(out, ref, rtol=2e-3, atol=2e-3), max_err
    print("KERNEL_OK")
</pallas_src>

<mosaic_0001>
module attributes {stable_mosaic.version = 11 : i64} {
  func.func @channel_attn_kernel(%arg0: i32, %arg1: memref<32x256xf32, #tpu.memory_space<vmem>>, %arg2: memref<4x256xf32, #tpu.memory_space<vmem>>, %arg3: memref<32x32xf32, #tpu.memory_space<vmem>>, %arg4: memref<192x33xf32, #tpu.memory_space<vmem>>, %arg5: memref<32x65xf32, #tpu.memory_space<vmem>>, %arg6: memref<32x256xf32, #tpu.memory_space<vmem>>, %arg7: memref<65x256xf32, #tpu.memory_space<vmem>>) attributes {dimension_semantics = [#tpu.dimension_semantics<parallel>], iteration_bounds = array<i64: 2>, scalar_prefetch = 0 : i64, scratch_operands = 1 : i64, tpu.core_type = #tpu.core_type<tc>, window_params = [{transform_indices = @transform_0, window_bounds = array<i64: 32, 256>}, {pipeline_mode = #tpu.pipeline_mode<synchronous>, transform_indices = @transform_1, window_bounds = array<i64: 4, 256>}, {pipeline_mode = #tpu.pipeline_mode<synchronous>, transform_indices = @transform_2, window_bounds = array<i64: 32, 32>}, {pipeline_mode = #tpu.pipeline_mode<synchronous>, transform_indices = @transform_3, window_bounds = array<i64: 192, 33>}, {pipeline_mode = #tpu.pipeline_mode<synchronous>, transform_indices = @transform_4, window_bounds = array<i64: 32, 65>}, {transform_indices = @transform_5, window_bounds = array<i64: 32, 256>}]} {
    %c0 = arith.constant 0 : index
    %c0_0 = arith.constant 0 : index
    %0 = vector.load %arg1[%c0, %c0_0] : memref<32x256xf32, #tpu.memory_space<vmem>>, vector<32x256xf32>
    %c0_1 = arith.constant 0 : index
    %c0_2 = arith.constant 0 : index
    %1 = vector.load %arg2[%c0_1, %c0_2] : memref<4x256xf32, #tpu.memory_space<vmem>>, vector<4x256xf32>
    %cst = arith.constant 1.000000e+00 : f32
    %2 = vector.broadcast %cst : f32 to vector<1x256xf32>
    %cst_3 = arith.constant dense<0.000000e+00> : vector<32x4xf32>
    %3 = tpu.matmul %0, %1, %cst_3 {dimension_numbers = #tpu.dot_dimension_numbers<[1], [1], [0], [0], [0, 0, 1, 0], [], []>} : vector<32x256xf32>, vector<4x256xf32>, vector<32x4xf32> -> vector<32x4xf32>
    %c0_4 = arith.constant 0 : index
    %c0_5 = arith.constant 0 : index
    %4 = vector.load %arg3[%c0_4, %c0_5] : memref<32x32xf32, #tpu.memory_space<vmem>>, vector<32x32xf32>
    %cst_6 = arith.constant dense<0.000000e+00> : vector<32x4xf32>
    %5 = tpu.matmul %4, %3, %cst_6 {dimension_numbers = #tpu.dot_dimension_numbers<[1], [0], [0], [1], [0, 0, 1, 1], [], []>} : vector<32x32xf32>, vector<32x4xf32>, vector<32x4xf32> -> vector<32x4xf32>
    %cst_7 = arith.constant dense<0.000000e+00> : vector<32x256xf32>
    %6 = tpu.matmul %5, %1, %cst_7 {dimension_numbers = #tpu.dot_dimension_numbers<[1], [0], [0], [1], [0, 0, 1, 1], [], []>} : vector<32x4xf32>, vector<4x256xf32>, vector<32x256xf32> -> vector<32x256xf32>
    %7 = arith.subf %0, %6 : vector<32x256xf32>
    %8 = arith.mulf %7, %7 : vector<32x256xf32>
    %cst_8 = arith.constant dense<0.000000e+00> : vector<32x4xf32>
    %9 = tpu.matmul %8, %1, %cst_8 {dimension_numbers = #tpu.dot_dimension_numbers<[1], [1], [0], [0], [0, 0, 1, 0], [], []>} : vector<32x256xf32>, vector<4x256xf32>, vector<32x4xf32> -> vector<32x4xf32>
    %c0_9 = arith.constant 0 : index
    %c0_10 = arith.constant 0 : index
    %10 = vector.load %arg3[%c0_9, %c0_10] : memref<32x32xf32, #tpu.memory_space<vmem>>, vector<32x32xf32>
    %cst_11 = arith.constant dense<0.000000e+00> : vector<32x4xf32>
    %11 = tpu.matmul %10, %9, %cst_11 {dimension_numbers = #tpu.dot_dimension_numbers<[1], [0], [0], [1], [0, 0, 1, 1], [], []>} : vector<32x32xf32>, vector<32x4xf32>, vector<32x4xf32> -> vector<32x4xf32>
    %cst_12 = arith.constant 9.99999997E-7 : f32
    %12 = vector.broadcast %cst_12 : f32 to vector<32x4xf32>
    %13 = arith.addf %11, %12 : vector<32x4xf32>
    %14 = math.rsqrt %13 : vector<32x4xf32>
    %cst_13 = arith.constant dense<0.000000e+00> : vector<32x256xf32>
    %15 = tpu.matmul %14, %1, %cst_13 {dimension_numbers = #tpu.dot_dimension_numbers<[1], [0], [0], [1], [0, 0, 1, 1], [], []>} : vector<32x4xf32>, vector<4x256xf32>, vector<32x256xf32> -> vector<32x256xf32>
    %16 = arith.mulf %7, %15 : vector<32x256xf32>
    %17 = tpu.concatenate %16, %2 in 0 : vector<32x256xf32>, vector<1x256xf32> -> vector<33x256xf32>
    %c0_14 = arith.constant 0 : index
    %c0_15 = arith.constant 0 : index
    %18 = vector.load %arg4[%c0_14, %c0_15] : memref<192x33xf32, #tpu.memory_space<vmem>>, vector<192x33xf32>
    %cst_16 = arith.constant dense<0.000000e+00> : vector<192x256xf32>
    %19 = tpu.matmul %18, %17, %cst_16 {dimension_numbers = #tpu.dot_dimension_numbers<[1], [0], [0], [1], [0, 0, 1, 1], [], []>} : vector<192x33xf32>, vector<33x256xf32>, vector<192x256xf32> -> vector<192x256xf32>
    %20 = vector.extract_strided_slice %19 {offsets = [0, 0], sizes = [32, 256], strides = [1, 1]} : vector<192x256xf32> to vector<32x256xf32>
    %21 = vector.extract_strided_slice %19 {offsets = [64, 0], sizes = [32, 256], strides = [1, 1]} : vector<192x256xf32> to vector<32x256xf32>
    %22 = vector.extract_strided_slice %19 {offsets = [128, 0], sizes = [32, 256], strides = [1, 1]} : vector<192x256xf32> to vector<32x256xf32>
    %cst_17 = arith.constant dense<0xFF800000> : vector<256xf32>
    %23 = vector.multi_reduction <maximumf>, %20, %cst_17 [0] : vector<32x256xf32> to vector<256xf32>
    %24 = vector.shape_cast %23 : vector<256xf32> to vector<1x256xf32>
    %25 = vector.broadcast %24 : vector<1x256xf32> to vector<32x256xf32>
    %26 = arith.subf %20, %25 : vector<32x256xf32>
    %27 = math.exp %26 : vector<32x256xf32>
    %cst_18 = arith.constant dense<0.000000e+00> : vector<256xf32>
    %28 = vector.multi_reduction <add>, %27, %cst_18 [0] : vector<32x256xf32> to vector<256xf32>
    %29 = vector.shape_cast %28 : vector<256xf32> to vector<1x256xf32>
    %30 = tpu.reciprocal %29 {approx = true} : vector<1x256xf32> -> vector<1x256xf32>
    %31 = vector.broadcast %30 : vector<1x256xf32> to vector<32x256xf32>
    %32 = arith.mulf %27, %31 : vector<32x256xf32>
    %cst_19 = arith.constant dense<0xFF800000> : vector<256xf32>
    %33 = vector.multi_reduction <maximumf>, %21, %cst_19 [0] : vector<32x256xf32> to vector<256xf32>
    %34 = vector.shape_cast %33 : vector<256xf32> to vector<1x256xf32>
    %35 = vector.broadcast %34 : vector<1x256xf32> to vector<32x256xf32>
    %36 = arith.subf %21, %35 : vector<32x256xf32>
    %37 = math.exp %36 : vector<32x256xf32>
    %cst_20 = arith.constant dense<0.000000e+00> : vector<256xf32>
    %38 = vector.multi_reduction <add>, %37, %cst_20 [0] : vector<32x256xf32> to vector<256xf32>
    %39 = vector.shape_cast %38 : vector<256xf32> to vector<1x256xf32>
    %40 = tpu.reciprocal %39 {approx = true} : vector<1x256xf32> -> vector<1x256xf32>
    %41 = vector.broadcast %40 : vector<1x256xf32> to vector<32x256xf32>
    %42 = arith.mulf %37, %41 : vector<32x256xf32>
    %43 = vector.extract_strided_slice %1 {offsets = [0, 0], sizes = [1, 256], strides = [1, 1]} : vector<4x256xf32> to vector<1x256xf32>
    %44 = vector.broadcast %43 : vector<1x256xf32> to vector<32x256xf32>
    %45 = arith.mulf %42, %44 : vector<32x256xf32>
    %cst_21 = arith.constant dense<0.000000e+00> : vector<32x32xf32>
    %46 = tpu.matmul %32, %45, %cst_21 {dimension_numbers = #tpu.dot_dimension_numbers<[1], [1], [0], [0], [0, 0, 1, 0], [], []>} : vector<32x256xf32>, vector<32x256xf32>, vector<32x32xf32> -> vector<32x32xf32>
    %47 = vector.broadcast %43 : vector<1x256xf32> to vector<32x256xf32>
    %48 = arith.mulf %22, %47 : vector<32x256xf32>
    %cst_22 = arith.constant dense<0.000000e+00> : vector<32x256xf32>
    %49 = tpu.matmul %46, %48, %cst_22 {dimension_numbers = #tpu.dot_dimension_numbers<[1], [0], [0], [1], [0, 0, 1, 1], [], []>} : vector<32x32xf32>, vector<32x256xf32>, vector<32x256xf32> -> vector<32x256xf32>
    %50 = vector.extract_strided_slice %1 {offsets = [1, 0], sizes = [1, 256], strides = [1, 1]} : vector<4x256xf32> to vector<1x256xf32>
    %51 = vector.broadcast %50 : vector<1x256xf32> to vector<32x256xf32>
    %52 = arith.mulf %42, %51 : vector<32x256xf32>
    %cst_23 = arith.constant dense<0.000000e+00> : vector<32x32xf32>
    %53 = tpu.matmul %32, %52, %cst_23 {dimension_numbers = #tpu.dot_dimension_numbers<[1], [1], [0], [0], [0, 0, 1, 0], [], []>} : vector<32x256xf32>, vector<32x256xf32>, vector<32x32xf32> -> vector<32x32xf32>
    %54 = vector.broadcast %50 : vector<1x256xf32> to vector<32x256xf32>
    %55 = arith.mulf %22, %54 : vector<32x256xf32>
    %cst_24 = arith.constant dense<0.000000e+00> : vector<32x256xf32>
    %56 = tpu.matmul %53, %55, %cst_24 {dimension_numbers = #tpu.dot_dimension_numbers<[1], [0], [0], [1], [0, 0, 1, 1], [], []>} : vector<32x32xf32>, vector<32x256xf32>, vector<32x256xf32> -> vector<32x256xf32>
    %57 = arith.addf %49, %56 : vector<32x256xf32>
    %58 = vector.extract_strided_slice %1 {offsets = [2, 0], sizes = [1, 256], strides = [1, 1]} : vector<4x256xf32> to vector<1x256xf32>
    %59 = vector.broadcast %58 : vector<1x256xf32> to vector<32x256xf32>
    %60 = arith.mulf %42, %59 : vector<32x256xf32>
    %cst_25 = arith.constant dense<0.000000e+00> : vector<32x32xf32>
    %61 = tpu.matmul %32, %60, %cst_25 {dimension_numbers = #tpu.dot_dimension_numbers<[1], [1], [0], [0], [0, 0, 1, 0], [], []>} : vector<32x256xf32>, vector<32x256xf32>, vector<32x32xf32> -> vector<32x32xf32>
    %62 = vector.broadcast %58 : vector<1x256xf32> to vector<32x256xf32>
    %63 = arith.mulf %22, %62 : vector<32x256xf32>
    %cst_26 = arith.constant dense<0.000000e+00> : vector<32x256xf32>
    %64 = tpu.matmul %61, %63, %cst_26 {dimension_numbers = #tpu.dot_dimension_numbers<[1], [0], [0], [1], [0, 0, 1, 1], [], []>} : vector<32x32xf32>, vector<32x256xf32>, vector<32x256xf32> -> vector<32x256xf32>
    %65 = arith.addf %57, %64 : vector<32x256xf32>
    %66 = vector.extract_strided_slice %1 {offsets = [3, 0], sizes = [1, 256], strides = [1, 1]} : vector<4x256xf32> to vector<1x256xf32>
    %67 = vector.broadcast %66 : vector<1x256xf32> to vector<32x256xf32>
    %68 = arith.mulf %42, %67 : vector<32x256xf32>
    %cst_27 = arith.constant dense<0.000000e+00> : vector<32x32xf32>
    %69 = tpu.matmul %32, %68, %cst_27 {dimension_numbers = #tpu.dot_dimension_numbers<[1], [1], [0], [0], [0, 0, 1, 0], [], []>} : vector<32x256xf32>, vector<32x256xf32>, vector<32x32xf32> -> vector<32x32xf32>
    %70 = vector.broadcast %66 : vector<1x256xf32> to vector<32x256xf32>
    %71 = arith.mulf %22, %70 : vector<32x256xf32>
    %cst_28 = arith.constant dense<0.000000e+00> : vector<32x256xf32>
    %72 = tpu.matmul %69, %71, %cst_28 {dimension_numbers = #tpu.dot_dimension_numbers<[1], [0], [0], [1], [0, 0, 1, 1], [], []>} : vector<32x32xf32>, vector<32x256xf32>, vector<32x256xf32> -> vector<32x256xf32>
    %73 = arith.addf %65, %72 : vector<32x256xf32>
    %c0_29 = arith.constant 0 : index
    %c0_30 = arith.constant 0 : index
    %74 = vector.load %arg7[%c0_29, %c0_30] : memref<65x256xf32, #tpu.memory_space<vmem>>, vector<32x256xf32>
    tpu.vector_store %arg7[%c0_29, %c0_30], %73 {strides = array<i32>} : memref<65x256xf32, #tpu.memory_space<vmem>>, vector<32x256xf32>,
    %75 = vector.extract_strided_slice %19 {offsets = [32, 0], sizes = [32, 256], strides = [1, 1]} : vector<192x256xf32> to vector<32x256xf32>
    %76 = vector.extract_strided_slice %19 {offsets = [96, 0], sizes = [32, 256], strides = [1, 1]} : vector<192x256xf32> to vector<32x256xf32>
    %77 = vector.extract_strided_slice %19 {offsets = [160, 0], sizes = [32, 256], strides = [1, 1]} : vector<192x256xf32> to vector<32x256xf32>
    %cst_31 = arith.constant dense<0xFF800000> : vector<256xf32>
    %78 = vector.multi_reduction <maximumf>, %75, %cst_31 [0] : vector<32x256xf32> to vector<256xf32>
    %79 = vector.shape_cast %78 : vector<256xf32> to vector<1x256xf32>
    %80 = vector.broadcast %79 : vector<1x256xf32> to vector<32x256xf32>
    %81 = arith.subf %75, %80 : vector<32x256xf32>
    %82 = math.exp %81 : vector<32x256xf32>
    %cst_32 = arith.constant dense<0.000000e+00> : vector<256xf32>
    %83 = vector.multi_reduction <add>, %82, %cst_32 [0] : vector<32x256xf32> to vector<256xf32>
    %84 = vector.shape_cast %83 : vector<256xf32> to vector<1x256xf32>
    %85 = tpu.reciprocal %84 {approx = true} : vector<1x256xf32> -> vector<1x256xf32>
    %86 = vector.broadcast %85 : vector<1x256xf32> to vector<32x256xf32>
    %87 = arith.mulf %82, %86 : vector<32x256xf32>
    %cst_33 = arith.constant dense<0xFF800000> : vector<256xf32>
    %88 = vector.multi_reduction <maximumf>, %76, %cst_33 [0] : vector<32x256xf32> to vector<256xf32>
    %89 = vector.shape_cast %88 : vector<256xf32> to vector<1x256xf32>
    %90 = vector.broadcast %89 : vector<1x256xf32> to vector<32x256xf32>
    %91 = arith.subf %76, %90 : vector<32x256xf32>
    %92 = math.exp %91 : vector<32x256xf32>
    %cst_34 = arith.constant dense<0.000000e+00> : vector<256xf32>
    %93 = vector.multi_reduction <add>, %92, %cst_34 [0] : vector<32x256xf32> to vector<256xf32>
    %94 = vector.shape_cast %93 : vector<256xf32> to vector<1x256xf32>
    %95 = tpu.reciprocal %94 {approx = true} : vector<1x256xf32> -> vector<1x256xf32>
    %96 = vector.broadcast %95 : vector<1x256xf32> to vector<32x256xf32>
    %97 = arith.mulf %92, %96 : vector<32x256xf32>
    %98 = vector.extract_strided_slice %1 {offsets = [0, 0], sizes = [1, 256], strides = [1, 1]} : vector<4x256xf32> to vector<1x256xf32>
    %99 = vector.broadcast %98 : vector<1x256xf32> to vector<32x256xf32>
    %100 = arith.mulf %97, %99 : vector<32x256xf32>
    %cst_35 = arith.constant dense<0.000000e+00> : vector<32x32xf32>
    %101 = tpu.matmul %87, %100, %cst_35 {dimension_numbers = #tpu.dot_dimension_numbers<[1], [1], [0], [0], [0, 0, 1, 0], [], []>} : vector<32x256xf32>, vector<32x256xf32>, vector<32x32xf32> -> vector<32x32xf32>
    %102 = vector.broadcast %98 : vector<1x256xf32> to vector<32x256xf32>
    %103 = arith.mulf %77, %102 : vector<32x256xf32>
    %cst_36 = arith.constant dense<0.000000e+00> : vector<32x256xf32>
    %104 = tpu.matmul %101, %103, %cst_36 {dimension_numbers = #tpu.dot_dimension_numbers<[1], [0], [0], [1], [0, 0, 1, 1], [], []>} : vector<32x32xf32>, vector<32x256xf32>, vector<32x256xf32> -> vector<32x256xf32>
    %105 = vector.extract_strided_slice %1 {offsets = [1, 0], sizes = [1, 256], strides = [1, 1]} : vector<4x256xf32> to vector<1x256xf32>
    %106 = vector.broadcast %105 : vector<1x256xf32> to vector<32x256xf32>
    %107 = arith.mulf %97, %106 : vector<32x256xf32>
    %cst_37 = arith.constant dense<0.000000e+00> : vector<32x32xf32>
    %108 = tpu.matmul %87, %107, %cst_37 {dimension_numbers = #tpu.dot_dimension_numbers<[1], [1], [0], [0], [0, 0, 1, 0], [], []>} : vector<32x256xf32>, vector<32x256xf32>, vector<32x32xf32> -> vector<32x32xf32>
    %109 = vector.broadcast %105 : vector<1x256xf32> to vector<32x256xf32>
    %110 = arith.mulf %77, %109 : vector<32x256xf32>
    %cst_38 = arith.constant dense<0.000000e+00> : vector<32x256xf32>
    %111 = tpu.matmul %108, %110, %cst_38 {dimension_numbers = #tpu.dot_dimension_numbers<[1], [0], [0], [1], [0, 0, 1, 1], [], []>} : vector<32x32xf32>, vector<32x256xf32>, vector<32x256xf32> -> vector<32x256xf32>
    %112 = arith.addf %104, %111 : vector<32x256xf32>
    %113 = vector.extract_strided_slice %1 {offsets = [2, 0], sizes = [1, 256], strides = [1, 1]} : vector<4x256xf32> to vector<1x256xf32>
    %114 = vector.broadcast %113 : vector<1x256xf32> to vector<32x256xf32>
    %115 = arith.mulf %97, %114 : vector<32x256xf32>
    %cst_39 = arith.constant dense<0.000000e+00> : vector<32x32xf32>
    %116 = tpu.matmul %87, %115, %cst_39 {dimension_numbers = #tpu.dot_dimension_numbers<[1], [1], [0], [0], [0, 0, 1, 0], [], []>} : vector<32x256xf32>, vector<32x256xf32>, vector<32x32xf32> -> vector<32x32xf32>
    %117 = vector.broadcast %113 : vector<1x256xf32> to vector<32x256xf32>
    %118 = arith.mulf %77, %117 : vector<32x256xf32>
    %cst_40 = arith.constant dense<0.000000e+00> : vector<32x256xf32>
    %119 = tpu.matmul %116, %118, %cst_40 {dimension_numbers = #tpu.dot_dimension_numbers<[1], [0], [0], [1], [0, 0, 1, 1], [], []>} : vector<32x32xf32>, vector<32x256xf32>, vector<32x256xf32> -> vector<32x256xf32>
    %120 = arith.addf %112, %119 : vector<32x256xf32>
    %121 = vector.extract_strided_slice %1 {offsets = [3, 0], sizes = [1, 256], strides = [1, 1]} : vector<4x256xf32> to vector<1x256xf32>
    %122 = vector.broadcast %121 : vector<1x256xf32> to vector<32x256xf32>
    %123 = arith.mulf %97, %122 : vector<32x256xf32>
    %cst_41 = arith.constant dense<0.000000e+00> : vector<32x32xf32>
    %124 = tpu.matmul %87, %123, %cst_41 {dimension_numbers = #tpu.dot_dimension_numbers<[1], [1], [0], [0], [0, 0, 1, 0], [], []>} : vector<32x256xf32>, vector<32x256xf32>, vector<32x32xf32> -> vector<32x32xf32>
    %125 = vector.broadcast %121 : vector<1x256xf32> to vector<32x256xf32>
    %126 = arith.mulf %77, %125 : vector<32x256xf32>
    %cst_42 = arith.constant dense<0.000000e+00> : vector<32x256xf32>
    %127 = tpu.matmul %124, %126, %cst_42 {dimension_numbers = #tpu.dot_dimension_numbers<[1], [0], [0], [1], [0, 0, 1, 1], [], []>} : vector<32x32xf32>, vector<32x256xf32>, vector<32x256xf32> -> vector<32x256xf32>
    %128 = arith.addf %120, %127 : vector<32x256xf32>
    %c32 = arith.constant 32 : index
    %c0_43 = arith.constant 0 : index
    %129 = vector.load %arg7[%c32, %c0_43] : memref<65x256xf32, #tpu.memory_space<vmem>>, vector<32x256xf32>
    tpu.vector_store %arg7[%c32, %c0_43], %128 {strides = array<i32>} : memref<65x256xf32, #tpu.memory_space<vmem>>, vector<32x256xf32>,
    %c64 = arith.constant 64 : index
    %c0_44 = arith.constant 0 : index
    %130 = vector.load %arg7[%c64, %c0_44] : memref<65x256xf32, #tpu.memory_space<vmem>>, vector<1x256xf32>
    tpu.vector_store %arg7[%c64, %c0_44], %2 {strides = array<i32>} : memref<65x256xf32, #tpu.memory_space<vmem>>, vector<1x256xf32>,
    %c0_45 = arith.constant 0 : index
    %c0_46 = arith.constant 0 : index
    %131 = vector.load %arg5[%c0_45, %c0_46] : memref<32x65xf32, #tpu.memory_space<vmem>>, vector<32x65xf32>
    %c0_47 = arith.constant 0 : index
    %c0_48 = arith.constant 0 : index
    %132 = vector.load %arg7[%c0_47, %c0_48] : memref<65x256xf32, #tpu.memory_space<vmem>>, vector<65x256xf32>
    %cst_49 = arith.constant dense<0.000000e+00> : vector<32x256xf32>
    %133 = tpu.matmul %131, %132, %cst_49 {dimension_numbers = #tpu.dot_dimension_numbers<[1], [0], [0], [1], [0, 0, 1, 1], [], []>} : vector<32x65xf32>, vector<65x256xf32>, vector<32x256xf32> -> vector<32x256xf32>
    %134 = arith.addf %0, %133 : vector<32x256xf32>
    %c0_50 = arith.constant 0 : index
    %c0_51 = arith.constant 0 : index
    %135 = vector.load %arg6[%c0_50, %c0_51] : memref<32x256xf32, #tpu.memory_space<vmem>>, vector<32x256xf32>
    tpu.vector_store %arg6[%c0_50, %c0_51], %134 {strides = array<i32>} : memref<32x256xf32, #tpu.memory_space<vmem>>, vector<32x256xf32>,
    return
  }
  func.func @transform_0(%arg0: i32) -> (i32, i32) {
    %c0_i32 = arith.constant 0 : i32
    %c0_i32_0 = arith.constant 0 : i32
    return %c0_i32, %arg0 : i32, i32
  }
  func.func @transform_1(%arg0: i32) -> (i32, i32) {
    %c0_i32 = arith.constant 0 : i32
    %c0_i32_0 = arith.constant 0 : i32
    %c0_i32_1 = arith.constant 0 : i32
    return %c0_i32, %c0_i32_0 : i32, i32
  }
  func.func @transform_2(%arg0: i32) -> (i32, i32) {
    %c0_i32 = arith.constant 0 : i32
    %c0_i32_0 = arith.constant 0 : i32
    %c0_i32_1 = arith.constant 0 : i32
    return %c0_i32, %c0_i32_0 : i32, i32
  }
  func.func @transform_3(%arg0: i32) -> (i32, i32) {
    %c0_i32 = arith.constant 0 : i32
    %c0_i32_0 = arith.constant 0 : i32
    %c0_i32_1 = arith.constant 0 : i32
    return %c0_i32, %c0_i32_0 : i32, i32
  }
  func.func @transform_4(%arg0: i32) -> (i32, i32) {
    %c0_i32 = arith.constant 0 : i32
    %c0_i32_0 = arith.constant 0 : i32
    %c0_i32_1 = arith.constant 0 : i32
    return %c0_i32, %c0_i32_0 : i32, i32
  }
  func.func @transform_5(%arg0: i32) -> (i32, i32) {
    %c0_i32 = arith.constant 0 : i32
    %c0_i32_0 = arith.constant 0 : i32
    return %c0_i32, %arg0 : i32, i32
  }
}

</mosaic_0001>

<bundles_post_ra>
// kernel: channel_attn_block.1
= control target key start
LH: loop header
LB: loop body
LE: loop exit
PB: predicated region body
PF: predicated region fallthrough
CT: control target
= control target key end

     0   :  { %s3033_s18 = smov 0   ;;  %s3035_s19 = smov 0   ;;  %s4294_s0 = inlined_call_operand.vmem [shape: f32[32,512], index: 0, kind: input, shape index: {}, may-alias: {0,5}]   ;;  %s4295_s1 = inlined_call_operand.vmem [shape: f32[4,256], index: 1, kind: input, shape index: {}]   ;;  %s4296_s2 = inlined_call_operand.vmem [shape: f32[32,32], index: 2, kind: input, shape index: {}]   ;;  %s4297_s3 = inlined_call_operand.vmem [shape: f32[192,33], index: 3, kind: input, shape index: {}]   ;;  %s4298_s4 = inlined_call_operand.vmem [shape: f32[32,65], index: 4, kind: input, shape index: {}]   ;;  %s4299_s5 = inlined_call_operand.vmem [shape: f32[32,512], index: 5, kind: output, shape index: {}, may-alias: {0,5}]  }
   0x1   :  { %s3037_s20 = smov 0  }
   0x2 LB: > { %s2688_s21 = sadd.s32 4294967295, %s3000_s20   ;;  %s3050_s22 = sadd.s32 1, %s3000_s20   ;;  %s3000_s20 = sphi %s3037_s20, %s4335_s20   ;;  %s2996_s19 = sphi %s3035_s19, %s4334_s19   ;;  %s2992_s18 = sphi %s3033_s18, %s4333_s18  }
   0x3   : > { %s19_s23 = ssub.s32 %s3000_s20, %s3050_s22  ;;  %s22_s24 = sadd.s32 1, %s2996_s19 }
   0x4   : > { %p20_p0 = scmp.eq.s32.totalorder %s19_s23, 0  ;;  %p29_p1 = scmp.ne.s32.totalorder %s2996_s19, %s2992_s18 }
   0x5   : > { %p30_p2 = scmp.eq.s32.totalorder %s3000_s20, 0  ;;  %p143_p3 = scmp.eq.s32.totalorder %s2688_s21, 1 }
   0x6   : > { %s3061_s25 = scalar_select %p20_p0, %s2996_s19, %s22_s24  }
   0x7   : > { %p31_p4 = por %p30_p2, %p29_p1  ;;  %p3063_p5 = por %p143_p3, %p29_p1 }
   0x8   : > { %p2691_p6 = scmp.ge.s32.totalorder %s3000_s20, 2 }
   0xa   : > { %177 = sbr.rel (%p2691_p6) target bundleno = 27 (0x1b), region = 32 }
   0xf   : > { %180 = sbr.rel (!%p31_p4) target bundleno = 27 (0x1b), region = 36  ;;  %s182_s27 = sand.u32 (%p31_p4), 1, %s2996_s19  }
  0x10   : > { %s2855_s28 = sshll.u32 (%p31_p4), %s3000_s20, 4  ;;  %s2692_s29 = sshll.u32 (%p31_p4), %s182_s27, 6 }
  0x11   : > { %s187_s7 = scalar_lea.vmem (%p31_p4), %s4294_s0, %s2855_s28  ;;  %s184_s8 = scalar_lea.vmem (%p31_p4), [#allocation3], %s2692_s29 }
  0x12   : > { %v200_v0 = vld [vmem:[%s187_s7] sm:$0xff] (%p31_p4)  ;;  %v202_v1 = vld [vmem:[%s187_s7 + $0x8] sm:$0xff] (%p31_p4) }
  0x13   : > { %v204_v2 = vld [vmem:[%s187_s7 + $0x20] sm:$0xff] (%p31_p4)  ;;  %201 = vst [vmem:[%s184_s8] sm:$0xff] (%p31_p4), %v200_v0  ;;  %v206_v3 = vld [vmem:[%s187_s7 + $0x28] sm:$0xff] (%p31_p4) }
  0x14   : > { %203 = vst [vmem:[%s184_s8 + $0x8] sm:$0xff] %v202_v1  ;;  %v208_v4 = vld [vmem:[%s187_s7 + $0x40] sm:$0xff]  ;;  %v210_v5 = vld [vmem:[%s187_s7 + $0x48] sm:$0xff] }
  0x15   : > { %205 = vst [vmem:[%s184_s8 + $0x10] sm:$0xff] %v204_v2  ;;  %v212_v6 = vld [vmem:[%s187_s7 + $0x60] sm:$0xff]  ;;  %v214_v7 = vld [vmem:[%s187_s7 + $0x68] sm:$0xff] }
  0x16   : > { %207 = vst [vmem:[%s184_s8 + $0x18] sm:$0xff] %v206_v3 }
  0x17   : > { %209 = vst [vmem:[%s184_s8 + $0x20] sm:$0xff] %v208_v4 }
  0x18   : > { %211 = vst [vmem:[%s184_s8 + $0x28] sm:$0xff] %v210_v5 }
  0x19   : > { %213 = vst [vmem:[%s184_s8 + $0x30] sm:$0xff] %v212_v6 }
  0x1a   : > { %215 = vst [vmem:[%s184_s8 + $0x38] sm:$0xff] %v214_v7 }
  0x1b PF: > { %p2695_p7 = scmp.ge.s32.totalorder %s3000_s20, 1  ;;  %p220_p8 = scmp.lt.s32.totalorder %s3000_s20, 3 }
  0x1d   : > { %p221_p9 = pnand %p2695_p7, %p220_p8 }
  0x1f   : > { %224 = sbr.rel (%p221_p9) target bundleno = 2367 (0x93f), region = 59 }
  0x24   : > { %v3078_v8 = vld [vmem:[%s4295_s1] sm:$0xff]  ;;  %s227_s11 = sand.u32 1, %s2992_s18   ;;  %vm332_vm0 = vcmask 261120   ;;  %v3130_v32 = vld [vmem:[%s4296_s2 + $0x8] sm:$0xff]  ;;  %v3137_v33 = vld [vmem:[%s4296_s2 + $0x10] sm:$0xff]  ;;  %vm390_vm1 = vcmask 1043456  }
  0x25   : > { %265 = vst [vmem:[#allocation1] ss:$2 sm:$0xff] %v3078_v8  ;;  %s3082_s12 = sshll.u32 %s227_s11, 6  ;;  %v3123_v31 = vld [vmem:[%s4296_s2] sm:$0xff]  ;;  %v3144_v34 = vld [vmem:[%s4296_s2 + $0x18] sm:$0xff]  ;;  %vm377_vm2 = vcmask 31744  }
  0x26   : > { %s3086_s13 = scalar_lea.vmem [#allocation3], %s3082_s12  ;;  %vm783_vm15 = vcmask 1040384   ;;  %s4253_s8 = scalar_lea.vmem [#allocation4], %s3082_s12 }
  0x27   : > { %v3089_v11 = vld [vmem:[%s3086_s13] sm:$0xff]  ;;  %v3092_v12 = vld [vmem:[%s3086_s13 + $0x8] sm:$0xff]  ;;  %v3097_v13 = vld [vmem:[%s3086_s13 + $0x10] sm:$0xff]  ;;  %s2856_s12 = sshll.u32 (%p3063_p5), %s2688_s21, 4 }
  0x28   : > { %v3100_v14 = vld [vmem:[%s3086_s13 + $0x18] sm:$0xff]  ;;  %v3105_v15 = vld [vmem:[%s3086_s13 + $0x20] sm:$0xff]  ;;  %v3108_v16 = vld [vmem:[%s3086_s13 + $0x28] sm:$0xff]  ;;  %s2600_s10 = scalar_lea.vmem (%p3063_p5), %s4299_s5, %s2856_s12 }
  0x29   : > { %v3113_v17 = vld [vmem:[%s3086_s13 + $0x30] sm:$0xff]  ;;  %v3116_v18 = vld [vmem:[%s3086_s13 + $0x38] sm:$0xff] }
  0x2c   : > { %v266_v9 = vld.sshfl [vmem:[#allocation1] sm:$0xff pattern:$0x75316420]  ;;  %v267_v10 = vld.sshfl [vmem:[#allocation1 + $0x8] sm:$0xff pattern:$0x75316420] }
  0x2d   : > { %285 = vmatpush.xpose.msra.mxu0 %v266_v9  ;;  %314 = vmatpush.xpose.msra.mxu1 %v267_v10  ;;  %374 = vst [vmem:[#allocation1] ss:$2 sm:$0xff] %v3078_v8 }
  0x30   : > { %286 = vmatmul.f32.vlgmr.msra.gmra.mxu0 %v3089_v11  ;;  %315 = vmatmul.f32.vlgmr.msra.gmra.mxu1 %v3092_v12 }
  0x34   : > { %v375_v35 = vld.sshfl [vmem:[#allocation1] sm:$0xff pattern:$0x75316420]  ;;  %v376_v36 = vld.sshfl [vmem:[#allocation1 + $0x8] sm:$0xff pattern:$0x75316420] }
  0x35   : > { %2702 = vmatpush.msk.msra.mxu3 %vm390_vm1, %v375_v35  ;;  %469 = vst [vmem:[#allocation1] ss:$2 sm:$0xff] %v3078_v8 }
  0x37   : > { %2707 = vmatpush.msk.msrb.mxu3 %vm390_vm1, %v376_v36 }
  0x38   : > { %289 = vmatmul.f32.gmra.mxu0 %v3097_v13  ;;  %318 = vmatmul.f32.gmra.mxu1 %v3100_v14 }
  0x3c   : > { %v470_v41 = vld.sshfl [vmem:[#allocation1] sm:$0xff pattern:$0x75316420]  ;;  %v471_v42 = vld.sshfl [vmem:[#allocation1 + $0x8] sm:$0xff pattern:$0x75316420] }
  0x3d   : > { %489 = vmatpush.xpose.msrb.mxu0 %v470_v41  ;;  %518 = vmatpush.xpose.msrb.mxu1 %v471_v42  ;;  %601 = vst [vmem:[#allocation1] ss:$2 sm:$0xff] %v3078_v8 }
  0x40   : > { %292 = vmatmul.f32.gmra.mxu0 %v3105_v15  ;;  %321 = vmatmul.f32.gmra.mxu1 %v3108_v16 }
  0x48   : > { %295 = vmatmul.f32.gmra.mxu0 %v3113_v17  ;;  %324 = vmatmul.f32.gmra.mxu1 %v3116_v18 }
  0xad   : > { %v287_v19 = vpop.f32.mrf.mxu0  ;;  %v316_v20 = vpop.f32.mrf.mxu1 }
  0xae   : > { %v317_v30 = vadd.f32 %v316_v20, %v287_v19 }
  0xb5   : > { %v290_v21 = vpop.f32.mrf.mxu0  ;;  %v319_v22 = vpop.f32.mrf.mxu1 }
  0xb6   : > { %v320_v29 = vadd.f32 %v319_v22, %v290_v21 }
  0xbd   : > { %v293_v23 = vpop.f32.mrf.mxu0  ;;  %v322_v24 = vpop.f32.mrf.mxu1 }
  0xbe   : > { %v323_v28 = vadd.f32 %v322_v24, %v293_v23 }
  0xc5   : > { %v296_v25 = vpop.f32.mrf.mxu0  ;;  %v325_v26 = vpop.f32.mrf.mxu1 }
  0xc6   : > { %v326_v27 = vadd.f32 %v325_v26, %v296_v25 }
  0xc8   : > { %357 = vmatpush.msra.mxu2 %v326_v27 }
  0xca   : > { %358 = vmatpush.msra.mxu2 %v323_v28 }
  0xcc   : > { %359 = vmatpush.msra.mxu2 %v320_v29 }
  0xce   : > { %360 = vmatpush.msra.mxu2 %v317_v30 }
  0xcf   : > { %2698 = vmatmul.msk.f32.vlgmr.msra.gmra.mxu2 %vm332_vm0, %v3123_v31 }
  0xd7   : > { %2699 = vmatmul.msk.f32.gmra.mxu2 %vm332_vm0, %v3130_v32 }
  0xdf   : > { %2700 = vmatmul.msk.f32.gmra.mxu2 %vm332_vm0, %v3137_v33 }
  0xe7   : > { %2701 = vmatmul.msk.f32.gmra.mxu2 %vm332_vm0, %v3144_v34 }
 0x152   : > { %v362_v37 = vpop.f32.mrf.mxu2 }
 0x153   : > { %2703 = vmatmul.msk.f32.vlgmr.msra.gmra.mxu3 %vm377_vm2, %v362_v37 }
 0x15a   : > { %v365_v38 = vpop.f32.mrf.mxu2 }
 0x15b   : > { %2704 = vmatmul.msk.f32.gmra.mxu3 %vm377_vm2, %v365_v38 }
 0x162   : > { %v368_v39 = vpop.f32.mrf.mxu2 }
 0x163   : > { %2705 = vmatmul.msk.f32.gmra.mxu3 %vm377_vm2, %v368_v39 }
 0x16a   : > { %v371_v40 = vpop.f32.mrf.mxu2 }
 0x16b   : > { %2706 = vmatmul.msk.f32.gmra.mxu3 %vm377_vm2, %v371_v40 }
 0x173   : > { %2708 = vmatmul.msk.f32.vlgmr.msrb.gmra.mxu3 %vm377_vm2, %v362_v37 }
 0x17b   : > { %2709 = vmatmul.msk.f32.gmra.mxu3 %vm377_vm2, %v365_v38 }
 0x183   : > { %2710 = vmatmul.msk.f32.gmra.mxu3 %vm377_vm2, %v368_v39 }
 0x18b   : > { %2711 = vmatmul.msk.f32.gmra.mxu3 %vm377_vm2, %v371_v40 }
 0x1d6   : > { %v412_v43 = vpop.f32.mrf.mxu3 }
 0x1d7   : > { %v3161_v44 = vsub.f32 %v3089_v11, %v412_v43 }
 0x1d9   : > { %v461_v45 = vmul.f32 %v3161_v44, %v3161_v44 }
 0x1db   : > { %490 = vmatmul.f32.vlgmr.msrb.gmra.mxu0 %v461_v45 }
 0x1de   : > { %v415_v46 = vpop.f32.mrf.mxu3 }
 0x1df   : > { %v3166_v47 = vsub.f32 %v3097_v13, %v415_v46 }
 0x1e1   : > { %v463_v48 = vmul.f32 %v3166_v47, %v3166_v47 }
 0x1e3   : > { %493 = vmatmul.f32.gmra.mxu0 %v463_v48 }
 0x1e6   : > { %v418_v49 = vpop.f32.mrf.mxu3 }
 0x1e7   : > { %v3171_v50 = vsub.f32 %v3105_v15, %v418_v49 }
 0x1e9   : > { %v465_v51 = vmul.f32 %v3171_v50, %v3171_v50 }
 0x1eb   : > { %496 = vmatmul.f32.gmra.mxu0 %v465_v51 }
 0x1ee   : > { %v421_v52 = vpop.f32.mrf.mxu3 }
 0x1ef   : > { %v3176_v53 = vsub.f32 %v3113_v17, %v421_v52  ;;  %v603_v17 = vld.sshfl [vmem:[#allocation1 + $0x8] sm:$0xff pattern:$0x75316420] }
 0x1f0   : > { %2721 = vmatpush.msk.msra.mxu0 %vm390_vm1, %v603_v17  ;;  %v694_v17 = vld [vmem:[%s4297_s3 + $0x40] sm:$0xff] }
 0x1f1   : > { %v467_v54 = vmul.f32 %v3176_v53, %v3176_v53 }
 0x1f3   : > { %499 = vmatmul.f32.gmra.mxu0 %v467_v54 }
 0x1f6   : > { %v441_v55 = vpop.f32.mrf.mxu3 }
 0x1f7   : > { %v3181_v56 = vsub.f32 %v3092_v12, %v441_v55 }
 0x1f9   : > { %v462_v57 = vmul.f32 %v3181_v56, %v3181_v56 }
 0x1fb   : > { %519 = vmatmul.f32.vlgmr.msrb.gmra.mxu1 %v462_v57 }
 0x1fe   : > { %v444_v58 = vpop.f32.mrf.mxu3 }
 0x1ff   : > { %v3186_v59 = vsub.f32 %v3100_v14, %v444_v58 }
 0x201   : > { %v464_v60 = vmul.f32 %v3186_v59, %v3186_v59 }
 0x203   : > { %522 = vmatmul.f32.gmra.mxu1 %v464_v60  ;;  %v3002_v60 = vmov 1.0  }
 0x204   : > { %2726 = vmatpush.msk.msra.mxu1 %vm783_vm15, %v3002_v60 }
 0x206   : > { %v447_v61 = vpop.f32.mrf.mxu3 }
 0x207   : > { %v3191_v62 = vsub.f32 %v3108_v16, %v447_v61  ;;  %v602_v16 = vld.sshfl [vmem:[#allocation1] sm:$0xff pattern:$0x75316420]  ;;  %v2469_v61 = vlaneseq }
 0x208   : > { %2716 = vmatpush.msk.msra.mxu3 %vm390_vm1, %v602_v16  ;;  %v693_v16 = vld [vmem:[%s4297_s3 + $0x38] sm:$0xff] }
 0x209   : > { %v466_v63 = vmul.f32 %v3191_v62, %v3191_v62  ;;  %vm2471_vm1 = vcmp.lt.s32.totalorder %v2469_v61, 256 }
 0x20a   : > { %2474 = vst.msk [vmem:[#allocation2 + $0x80] ss:$8 sm:$0x3] %vm2471_vm1, %v3002_v60 }
 0x20b   : > { %525 = vmatmul.f32.gmra.mxu1 %v466_v63 }
 0x20e   : > { %v450_v0 = vpop.f32.mrf.mxu3 }
 0x20f   : > { %v3196_v1 = vsub.f32 %v3116_v18, %v450_v0 }
 0x211   : > { %v468_v2 = vmul.f32 %v3196_v1, %v3196_v1 }
 0x213   : > { %528 = vmatmul.f32.gmra.mxu1 %v468_v2 }
 0x258   : > { %v491_v3 = vpop.f32.mrf.mxu0 }
 0x260   : > { %v494_v5 = vpop.f32.mrf.mxu0 }
 0x268   : > { %v497_v7 = vpop.f32.mrf.mxu0 }
 0x270   : > { %v500_v10 = vpop.f32.mrf.mxu0 }
 0x278   : > { %v520_v4 = vpop.f32.mrf.mxu1 }
 0x279   : > { %v521_v15 = vadd.f32 %v520_v4, %v491_v3 }
 0x280   : > { %v523_v6 = vpop.f32.mrf.mxu1 }
 0x281   : > { %v524_v14 = vadd.f32 %v523_v6, %v494_v5 }
 0x288   : > { %v526_v9 = vpop.f32.mrf.mxu1 }
 0x289   : > { %v527_v13 = vadd.f32 %v526_v9, %v497_v7 }
 0x290   : > { %v529_v11 = vpop.f32.mrf.mxu1 }
 0x291   : > { %v530_v12 = vadd.f32 %v529_v11, %v500_v10 }
 0x293   : > { %544 = vmatpush.msrb.mxu2 %v530_v12 }
 0x295   : > { %545 = vmatpush.msrb.mxu2 %v527_v13 }
 0x297   : > { %546 = vmatpush.msrb.mxu2 %v524_v14  ;;  %v686_v14 = vld [vmem:[%s4297_s3] sm:$0xff] }
 0x299   : > { %547 = vmatpush.msrb.mxu2 %v521_v15 }
 0x29a   : > { %2712 = vmatmul.msk.f32.vlgmr.msrb.gmra.mxu2 %vm332_vm0, %v3123_v31 }
 0x29b   : > { %2751 = vmatpush.msk.msra.mxu2 %vm783_vm15, %v3002_v60 }
 0x2a2   : > { %2713 = vmatmul.msk.f32.gmra.mxu2 %vm332_vm0, %v3130_v32 }
 0x2aa   : > { %2714 = vmatmul.msk.f32.gmra.mxu2 %vm332_vm0, %v3137_v33 }
 0x2b2   : > { %2715 = vmatmul.msk.f32.gmra.mxu2 %vm332_vm0, %v3144_v34 }
 0x31d   : > { %v549_v18 = vpop.f32.mrf.mxu2 }
 0x31e   : > { %v550_v19 = vadd.f32 1e-06, %v549_v18  ;;  %v695_v18 = vld [vmem:[%s4297_s3 + $0x48] sm:$0xff] }
 0x320   : > { %2882 = vrsqrt.f32 %v550_v19  ;;  %vm567_vm4 = vweird.f32 %v550_v19 }
 0x325   : > { %v552_v20 = vpop.f32.mrf.mxu2 }
 0x326   : > { %v2883_v21 = vpop.eup %2882  ;;  %v553_v22 = vadd.f32 1e-06, %v552_v20  ;;  %v697_v20 = vld [vmem:[%s4297_s3 + $0x58] sm:$0xff] }
 0x327   : > { %v562_v23 = vmul.f32 %v2883_v21, %v550_v19  ;;  %vm568_vm3 = vweird.f32 %v2883_v21  ;;  %v696_v19 = vld [vmem:[%s4297_s3 + $0x50] sm:$0xff] }
 0x328   : > { %2884 = vrsqrt.f32 %v553_v22  ;;  %vm569_vm5 = vmor %vm567_vm4, %vm568_vm3  ;;  %vm577_vm7 = vweird.f32 %v553_v22 }
 0x329   : > { %v563_v24 = vmul.f32 %v2883_v21, %v562_v23  ;;  %v700_v23 = vld [vmem:[%s4297_s3 + $0x70] sm:$0xff] }
 0x32b   : > { %v564_v25 = vmul.f32 0.5, %v563_v24  ;;  %v701_v24 = vld [vmem:[%s4297_s3 + $0x78] sm:$0xff] }
 0x32d   : > { %v565_v26 = vsub.f32 1.5, %v564_v25  ;;  %v555_v27 = vpop.f32.mrf.mxu2 }
 0x32e   : > { %v2885_v28 = vpop.eup %2884  ;;  %v556_v29 = vadd.f32 1e-06, %v555_v27 }
 0x32f   : > { %v572_v30 = vmul.f32 %v2885_v28, %v553_v22  ;;  %v566_v31 = vmul.f32 %v2883_v21, %v565_v26  ;;  %vm578_vm6 = vweird.f32 %v2885_v28  ;;  %v699_v22 = vld [vmem:[%s4297_s3 + $0x68] sm:$0xff] }
 0x330   : > { %2886 = vrsqrt.f32 %v556_v29  ;;  %vm579_vm8 = vmor %vm577_vm7, %vm578_vm6  ;;  %vm587_vm10 = vweird.f32 %v556_v29 }
 0x331   : > { %v573_v32 = vmul.f32 %v2885_v28, %v572_v30  ;;  %v570_v33 = vsel %vm569_vm5, %v2883_v21, %v566_v31  ;;  %v698_v21 = vld [vmem:[%s4297_s3 + $0x60] sm:$0xff] }
 0x332   : > { %2717 = vmatmul.msk.f32.vlgmr.msra.gmra.mxu3 %vm377_vm2, %v570_v33  ;;  %2722 = vmatmul.msk.f32.vlgmr.msra.gmra.mxu0 %vm377_vm2, %v570_v33 }
 0x333   : > { %v574_v34 = vmul.f32 0.5, %v573_v32 }
 0x335   : > { %v558_v35 = vpop.f32.mrf.mxu2  ;;  %v575_v36 = vsub.f32 1.5, %v574_v34 }
 0x336   : > { %v2887_v37 = vpop.eup %2886  ;;  %v559_v38 = vadd.f32 1e-06, %v558_v35 }
 0x337   : > { %v582_v39 = vmul.f32 %v2887_v37, %v556_v29  ;;  %v576_v40 = vmul.f32 %v2885_v28, %v575_v36  ;;  %vm588_vm9 = vweird.f32 %v2887_v37 }
 0x338   : > { %2888 = vrsqrt.f32 %v559_v38  ;;  %vm589_vm11 = vmor %vm587_vm10, %vm588_vm9  ;;  %vm597_vm13 = vweird.f32 %v559_v38 }
 0x339   : > { %v583_v41 = vmul.f32 %v2887_v37, %v582_v39  ;;  %v580_v42 = vsel %vm579_vm8, %v2885_v28, %v576_v40  ;;  %v703_v40 = vld [vmem:[%s4297_s3 + $0x88] sm:$0xff] }
 0x33a   : > { %2718 = vmatmul.msk.f32.gmra.mxu3 %vm377_vm2, %v580_v42  ;;  %2723 = vmatmul.msk.f32.gmra.mxu0 %vm377_vm2, %v580_v42 }
 0x33b   : > { %v584_v43 = vmul.f32 0.5, %v583_v41 }
 0x33d   : > { %v585_v45 = vsub.f32 1.5, %v584_v43 }
 0x33e   : > { %v2889_v46 = vpop.eup %2888 }
 0x33f   : > { %v592_v48 = vmul.f32 %v2889_v46, %v559_v38  ;;  %v586_v49 = vmul.f32 %v2887_v37, %v585_v45  ;;  %vm598_vm12 = vweird.f32 %v2889_v46 }
 0x340   : > { %vm599_vm14 = vmor %vm597_vm13, %vm598_vm12 }
 0x341   : > { %v593_v51 = vmul.f32 %v2889_v46, %v592_v48  ;;  %v590_v52 = vsel %vm589_vm11, %v2887_v37, %v586_v49  ;;  %v702_v37 = vld [vmem:[%s4297_s3 + $0x80] sm:$0xff] }
 0x342   : > { %2719 = vmatmul.msk.f32.gmra.mxu3 %vm377_vm2, %v590_v52  ;;  %2724 = vmatmul.msk.f32.gmra.mxu0 %vm377_vm2, %v590_v52 }
 0x343   : > { %v594_v54 = vmul.f32 0.5, %v593_v51 }
 0x345   : > { %v595_v55 = vsub.f32 1.5, %v594_v54 }
 0x347   : > { %v596_v57 = vmul.f32 %v2889_v46, %v595_v55 }
 0x349   : > { %v600_v58 = vsel %vm599_vm14, %v2889_v46, %v596_v57  ;;  %v704_v46 = vld [vmem:[%s4297_s3 + $0x90] sm:$0xff] }
 0x34a   : > { %2720 = vmatmul.msk.f32.gmra.mxu3 %vm377_vm2, %v600_v58  ;;  %2725 = vmatmul.msk.f32.gmra.mxu0 %vm377_vm2, %v600_v58  ;;  %vm710_vm2 = vcmask 269312   ;;  %v705_v58 = vld [vmem:[%s4297_s3 + $0x98] sm:$0xff] }
 0x3af   : > { %v666_v63 = vpop.f32.mrf.mxu0 }
 0x3b0   : > { %v679_v12 = vmul.f32 %v666_v63, %v3181_v56  ;;  %v691_v56 = vld [vmem:[%s4297_s3 + $0x28] sm:$0xff] }
 0x3b5   : > { %v637_v0 = vpop.f32.mrf.mxu3 }
 0x3b7   : > { %v669_v2 = vpop.f32.mrf.mxu0 }
 0x3b8   : > { %v681_v10 = vmul.f32 %v669_v2, %v3186_v59 }
 0x3bd   : > { %v640_v3 = vpop.f32.mrf.mxu3 }
 0x3be   : > { %v680_v59 = vmul.f32 %v640_v3, %v3166_v47  ;;  %v690_v47 = vld [vmem:[%s4297_s3 + $0x20] sm:$0xff] }
 0x3bf   : > { %v672_v4 = vpop.f32.mrf.mxu0 }
 0x3c0   : > { %v683_v9 = vmul.f32 %v672_v4, %v3191_v62  ;;  %v678_v62 = vmul.f32 %v637_v0, %v3161_v44  ;;  %v689_v44 = vld [vmem:[%s4297_s3 + $0x18] sm:$0xff]  ;;  %v706_v4 = vld [vmem:[%s4297_s3 + $0xa0] sm:$0xff] }
 0x3c5   : > { %v643_v5 = vpop.f32.mrf.mxu3 }
 0x3c6   : > { %v682_v15 = vmul.f32 %v643_v5, %v3171_v50  ;;  %v688_v50 = vld [vmem:[%s4297_s3 + $0x10] sm:$0xff] }
 0x3c7   : > { %v675_v6 = vpop.f32.mrf.mxu0 }
 0x3c8   : > { %v685_v7 = vmul.f32 %v675_v6, %v3196_v1  ;;  %v692_v1 = vld [vmem:[%s4297_s3 + $0x30] sm:$0xff] }
 0x3ca   : > { %888 = vmatpush.msra.mxu2 %v685_v7 }
 0x3cc   : > { %889 = vmatpush.msra.mxu2 %v683_v9 }
 0x3cd   : > { %v646_v11 = vpop.f32.mrf.mxu3 }
 0x3ce   : > { %v684_v13 = vmul.f32 %v646_v11, %v3176_v53  ;;  %890 = vmatpush.msra.mxu2 %v681_v10  ;;  %v687_v53 = vld [vmem:[%s4297_s3 + $0x8] sm:$0xff] }
 0x3d0   : > { %799 = vmatpush.msra.mxu1 %v684_v13  ;;  %891 = vmatpush.msra.mxu2 %v679_v12 }
 0x3d1   : > { %2752 = vmatmul.msk.f32.vlgmr.msra.gmra.mxu2 %vm710_vm2, %v686_v14 }
 0x3d2   : > { %800 = vmatpush.msra.mxu1 %v682_v15 }
 0x3d4   : > { %801 = vmatpush.msra.mxu1 %v680_v59 }
 0x3d6   : > { %802 = vmatpush.msra.mxu1 %v678_v62 }
 0x3d7   : > { %2727 = vmatmul.msk.f32.vlgmr.msra.gmra.mxu1 %vm710_vm2, %v686_v14  ;;  %v707_v14 = vld [vmem:[%s4297_s3 + $0xa8] sm:$0xff] }
 0x3d9   : > { %2753 = vmatmul.msk.f32.gmra.mxu2 %vm710_vm2, %v687_v53 }
 0x3df   : > { %2728 = vmatmul.msk.f32.gmra.mxu1 %vm710_vm2, %v687_v53 }
 0x3e1   : > { %2754 = vmatmul.msk.f32.gmra.mxu2 %vm710_vm2, %v688_v50 }
 0x3e7   : > { %2729 = vmatmul.msk.f32.gmra.mxu1 %vm710_vm2, %v688_v50 }
 0x3e9   : > { %2755 = vmatmul.msk.f32.gmra.mxu2 %vm710_vm2, %v689_v44 }
 0x3ef   : > { %2730 = vmatmul.msk.f32.gmra.mxu1 %vm710_vm2, %v689_v44 }
 0x3f1   : > { %2756 = vmatmul.msk.f32.gmra.mxu2 %vm710_vm2, %v690_v47 }
 0x3f7   : > { %2731 = vmatmul.msk.f32.gmra.mxu1 %vm710_vm2, %v690_v47 }
 0x3f9   : > { %2757 = vmatmul.msk.f32.gmra.mxu2 %vm710_vm2, %v691_v56 }
 0x3ff   : > { %2732 = vmatmul.msk.f32.gmra.mxu1 %vm710_vm2, %v691_v56 }
 0x401   : > { %2758 = vmatmul.msk.f32.gmra.mxu2 %vm710_vm2, %v692_v1 }
 0x407   : > { %2733 = vmatmul.msk.f32.gmra.mxu1 %vm710_vm2, %v692_v1 }
 0x409   : > { %2759 = vmatmul.msk.f32.gmra.mxu2 %vm710_vm2, %v693_v16 }
 0x40f   : > { %2734 = vmatmul.msk.f32.gmra.mxu1 %vm710_vm2, %v693_v16 }
 0x411   : > { %2760 = vmatmul.msk.f32.gmra.mxu2 %vm710_vm2, %v694_v17 }
 0x417   : > { %2735 = vmatmul.msk.f32.gmra.mxu1 %vm710_vm2, %v694_v17 }
 0x419   : > { %2761 = vmatmul.msk.f32.gmra.mxu2 %vm710_vm2, %v695_v18 }
 0x41f   : > { %2736 = vmatmul.msk.f32.gmra.mxu1 %vm710_vm2, %v695_v18 }
 0x421   : > { %2762 = vmatmul.msk.f32.gmra.mxu2 %vm710_vm2, %v696_v19 }
 0x427   : > { %2737 = vmatmul.msk.f32.gmra.mxu1 %vm710_vm2, %v696_v19 }
 0x429   : > { %2763 = vmatmul.msk.f32.gmra.mxu2 %vm710_vm2, %v697_v20 }
 0x42f   : > { %2738 = vmatmul.msk.f32.gmra.mxu1 %vm710_vm2, %v697_v20 }
 0x431   : > { %2764 = vmatmul.msk.f32.gmra.mxu2 %vm710_vm2, %v698_v21 }
 0x437   : > { %2739 = vmatmul.msk.f32.gmra.mxu1 %vm710_vm2, %v698_v21 }
 0x439   : > { %2765 = vmatmul.msk.f32.gmra.mxu2 %vm710_vm2, %v699_v22 }
 0x43f   : > { %2740 = vmatmul.msk.f32.gmra.mxu1 %vm710_vm2, %v699_v22 }
 0x441   : > { %2766 = vmatmul.msk.f32.gmra.mxu2 %vm710_vm2, %v700_v23 }
 0x447   : > { %2741 = vmatmul.msk.f32.gmra.mxu1 %vm710_vm2, %v700_v23 }
 0x449   : > { %2767 = vmatmul.msk.f32.gmra.mxu2 %vm710_vm2, %v701_v24 }
 0x44f   : > { %2742 = vmatmul.msk.f32.gmra.mxu1 %vm710_vm2, %v701_v24 }
 0x451   : > { %2768 = vmatmul.msk.f32.gmra.mxu2 %vm710_vm2, %v702_v37 }
 0x454   : > { %v3308_v25 = vpop.f32.mrf.mxu1  ;;  %v3310_v26 = vpop.f32.mrf.mxu2 }
 0x457   : > { %2743 = vmatmul.msk.f32.gmra.mxu1 %vm710_vm2, %v702_v37 }
 0x459   : > { %2769 = vmatmul.msk.f32.gmra.mxu2 %vm710_vm2, %v703_v40 }
 0x45c   : > { %v3312_v27 = vpop.f32.mrf.mxu1  ;;  %v3314_v28 = vpop.f32.mrf.mxu2 }
 0x45f   : > { %2744 = vmatmul.msk.f32.gmra.mxu1 %vm710_vm2, %v703_v40 }
 0x461   : > { %2770 = vmatmul.msk.f32.gmra.mxu2 %vm710_vm2, %v704_v46 }
 0x464   : > { %v3316_v29 = vpop.f32.mrf.mxu1  ;;  %v3318_v30 = vpop.f32.mrf.mxu2 }
 0x465   : > { %v965_v45 = vmax.f32 %v3308_v25, %v3316_v29  ;;  %v974_v54 = vmax.f32 %v3310_v26, %v3318_v30 }
 0x467   : > { %2745 = vmatmul.msk.f32.gmra.mxu1 %vm710_vm2, %v704_v46 }
 0x469   : > { %2771 = vmatmul.msk.f32.gmra.mxu2 %vm710_vm2, %v705_v58 }
 0x46c   : > { %v3320_v31 = vpop.f32.mrf.mxu1  ;;  %v3322_v32 = vpop.f32.mrf.mxu2 }
 0x46d   : > { %v966_v43 = vmax.f32 %v3312_v27, %v3320_v31  ;;  %v975_v49 = vmax.f32 %v3314_v28, %v3322_v32 }
 0x46f   : > { %v967_v48 = vmax.f32 %v965_v45, %v966_v43  ;;  %v976_v57 = vmax.f32 %v974_v54, %v975_v49  ;;  %2746 = vmatmul.msk.f32.gmra.mxu1 %vm710_vm2, %v705_v58 }
 0x471   : > { %v968_v55 = vrot.slane %v967_v48, 4  ;;  %v977_v61 = vrot.slane %v976_v57, 4  ;;  %2772 = vmatmul.msk.f32.gmra.mxu2 %vm710_vm2, %v706_v4 }
 0x473   : > { %v969_v60 = vmax.f32 %v967_v48, %v968_v55  ;;  %v978_v3 = vmax.f32 %v976_v57, %v977_v61 }
 0x474   : > { %v3324_v33 = vpop.f32.mrf.mxu1  ;;  %v3326_v34 = vpop.f32.mrf.mxu2 }
 0x475   : > { %v970_v2 = vrot.slane %v969_v60, 2  ;;  %v979_v6 = vrot.slane %v978_v3, 2 }
 0x477   : > { %v971_v5 = vmax.f32 %v969_v60, %v970_v2  ;;  %2747 = vmatmul.msk.f32.gmra.mxu1 %vm710_vm2, %v706_v4  ;;  %v980_v11 = vmax.f32 %v978_v3, %v979_v6 }
 0x479   : > { %v972_v10 = vrot.slane %v971_v5, 1  ;;  %v981_v59 = vrot.slane %v980_v11, 1  ;;  %2773 = vmatmul.msk.f32.gmra.mxu2 %vm710_vm2, %v707_v14 }
 0x47b   : > { %v973_v15 = vmax.f32 %v971_v5, %v972_v10  ;;  %v3410_v22 = vmax.f32 %v980_v11, %v981_v59 }
 0x47c   : > { %v3328_v35 = vpop.f32.mrf.mxu1  ;;  %v3330_v36 = vpop.f32.mrf.mxu2 }
 0x47d   : > { %v983_v18 = vsub.f32 %v3308_v25, %v973_v15  ;;  %v985_v21 = vsub.f32 %v3312_v27, %v973_v15  ;;  %v987_v40 = vsub.f32 %v3316_v29, %v973_v15  ;;  %v708_v25 = vld [vmem:[%s4297_s3 + $0xb0] sm:$0xff]  ;;  %v989_v46 = vsub.f32 %v3320_v31, %v973_v15 }
 0x47e   : > { %v984_v57 = vsub.f32 %v3310_v26, %v3410_v22  ;;  %v986_v31 = vsub.f32 %v3314_v28, %v3410_v22  ;;  %v988_v2 = vsub.f32 %v3318_v30, %v3410_v22  ;;  %v709_v28 = vld [vmem:[%s4297_s3 + $0xb8] sm:$0xff] }
 0x47f   : > { %2748 = vmatmul.msk.f32.gmra.mxu1 %vm710_vm2, %v707_v14  ;;  %v991_v48 = vmul.f32 1.442695, %v983_v18  ;;  %v995_v29 = vmul.f32 1.442695, %v985_v21  ;;  %v999_v61 = vmul.f32 1.442695, %v987_v40 }
 0x480   : > { %v1003_v5 = vmul.f32 1.442695, %v989_v46  ;;  %v993_v11 = vmul.f32 1.442695, %v984_v57  ;;  %v997_v26 = vmul.f32 1.442695, %v986_v31 }
 0x481   : > { %2774 = vmatmul.msk.f32.gmra.mxu2 %vm710_vm2, %v708_v25  ;;  %2890 = vpow2.f32 %v991_v48  ;;  %v1001_v14 = vmul.f32 1.442695, %v988_v2 }
 0x482   : > { %2892 = vpow2.f32 %v995_v29 }
 0x483   : > { %2894 = vpow2.f32 %v999_v61 }
 0x484   : > { %v3335_v38 = vpop.f32.mrf.mxu1  ;;  %v3337_v39 = vpop.f32.mrf.mxu2  ;;  %2896 = vpow2.f32 %v1003_v5 }
 0x485   : > { %v1729_v13 = vmax.f32 %v3324_v33, %v3335_v38  ;;  %v1738_v37 = vmax.f32 %v3326_v34, %v3337_v39  ;;  %2898 = vpow2.f32 %v993_v11 }
 0x486   : > { %2900 = vpow2.f32 %v997_v26 }
 0x487   : > { %2749 = vmatmul.msk.f32.gmra.mxu1 %vm710_vm2, %v708_v25  ;;  %2902 = vpow2.f32 %v1001_v14 }
 0x489   : > { %2775 = vmatmul.msk.f32.gmra.mxu2 %vm710_vm2, %v709_v28 }
 0x48c   : > { %v3344_v41 = vpop.f32.mrf.mxu1  ;;  %v3346_v42 = vpop.f32.mrf.mxu2 }
 0x48d   : > { %v1730_v12 = vmax.f32 %v3328_v35, %v3344_v41  ;;  %v1739_v20 = vmax.f32 %v3330_v36, %v3346_v42 }
 0x48f   : > { %v1731_v62 = vmax.f32 %v1729_v13, %v1730_v12  ;;  %v1740_v27 = vmax.f32 %v1738_v37, %v1739_v20  ;;  %2750 = vmatmul.msk.f32.gmra.mxu1 %vm710_vm2, %v709_v28 }
 0x491   : > { %v1732_v19 = vrot.slane %v1731_v62, 4  ;;  %v1741_v10 = vrot.slane %v1740_v27, 4 }
 0x493   : > { %v1733_v49 = vmax.f32 %v1731_v62, %v1732_v19  ;;  %v1742_v62 = vmax.f32 %v1740_v27, %v1741_v10 }
 0x494   : > { %v3359_v51 = vpop.f32.mrf.mxu1  ;;  %v3361_v52 = vpop.f32.mrf.mxu2 }
 0x495   : > { %v1734_v6 = vrot.slane %v1733_v49, 2  ;;  %v1743_v40 = vrot.slane %v1742_v62, 2 }
 0x497   : > { %v1735_v30 = vmax.f32 %v1733_v49, %v1734_v6  ;;  %v1744_v27 = vmax.f32 %v1742_v62, %v1743_v40 }
 0x49c   : > { %v3370_v63 = vpop.f32.mrf.mxu1  ;;  %v3372_v0 = vpop.f32.mrf.mxu2 }
 0x4a4   : > { %v3379_v7 = vpop.f32.mrf.mxu1  ;;  %v3381_v9 = vpop.f32.mrf.mxu2 }
 0x4a5   : > { %v1035_v44 = vmax.f32 %v3359_v51, %v3379_v7  ;;  %v1044_v47 = vmax.f32 %v3361_v52, %v3381_v9 }
 0x4ac   : > { %v3392_v53 = vpop.f32.mrf.mxu1  ;;  %v3394_v50 = vpop.f32.mrf.mxu2 }
 0x4ad   : > { %v1036_v56 = vmax.f32 %v3370_v63, %v3392_v53  ;;  %v1045_v1 = vmax.f32 %v3372_v0, %v3394_v50 }
 0x4af   : > { %v1037_v16 = vmax.f32 %v1035_v44, %v1036_v56  ;;  %v1046_v17 = vmax.f32 %v1044_v47, %v1045_v1 }
 0x4b1   : > { %v1038_v23 = vrot.slane %v1037_v16, 4  ;;  %v1047_v24 = vrot.slane %v1046_v17, 4 }
 0x4b3   : > { %v1039_v43 = vmax.f32 %v1037_v16, %v1038_v23  ;;  %v1048_v45 = vmax.f32 %v1046_v17, %v1047_v24  ;;  %v3443_v17 = vpop.eup %2890 }
 0x4b4   : > { %v3419_v54 = vpop.f32.mrf.mxu1  ;;  %v3421_v55 = vpop.f32.mrf.mxu2 }
 0x4b5   : > { %v1040_v58 = vrot.slane %v1039_v43, 2  ;;  %v1049_v60 = vrot.slane %v1048_v45, 2  ;;  %v3448_v21 = vpop.eup %2892 }
 0x4b7   : > { %v1041_v3 = vmax.f32 %v1039_v43, %v1040_v58  ;;  %v1050_v4 = vmax.f32 %v1048_v45, %v1049_v60  ;;  %v3451_v43 = vpop.eup %2894 }
 0x4b8   : > { %v3455_v45 = vpop.eup %2896 }
 0x4b9   : > { %v1042_v12 = vrot.slane %v1041_v3, 1  ;;  %v1051_v13 = vrot.slane %v1050_v4, 1  ;;  %v3460_v48 = vpop.eup %2898 }
 0x4bb   : > { %v1043_v15 = vmax.f32 %v1041_v3, %v1042_v12  ;;  %v1052_v59 = vmax.f32 %v1050_v4, %v1051_v13  ;;  %v1745_v4 = vrot.slane %v1744_v27, 1 }
 0x4bc   : > { %v3434_v44 = vpop.f32.mrf.mxu1  ;;  %v3436_v47 = vpop.f32.mrf.mxu2 }
 0x4bd   : > { %v1053_v56 = vsub.f32 %v3359_v51, %v1043_v15  ;;  %v1055_v1 = vsub.f32 %v3370_v63, %v1043_v15  ;;  %v1057_v16 = vsub.f32 %v3379_v7, %v1043_v15  ;;  %v1059_v18 = vsub.f32 %v3392_v53, %v1043_v15 }
 0x4be   : > { %v1054_v19 = vsub.f32 %v3361_v52, %v1052_v59  ;;  %v1056_v20 = vsub.f32 %v3372_v0, %v1052_v59  ;;  %v1736_v51 = vrot.slane %v1735_v30, 1  ;;  %v1058_v7 = vsub.f32 %v3381_v9, %v1052_v59  ;;  %v3462_v9 = vpop.eup %2900 }
 0x4bf   : > { %v1061_v23 = vmul.f32 1.442695, %v1053_v56  ;;  %v1065_v24 = vmul.f32 1.442695, %v1055_v1  ;;  %v1069_v37 = vmul.f32 1.442695, %v1057_v16  ;;  %v990_v53 = vsub.f32 %v3322_v32, %v3410_v22  ;;  %v3468_v57 = vpop.eup %2902 }
 0x4c0   : > { %v1073_v63 = vmul.f32 1.442695, %v1059_v18  ;;  %v1063_v52 = vmul.f32 1.442695, %v1054_v19  ;;  %v1007_v0 = vadd.f32 %v3448_v21, %v3443_v17  ;;  %v1060_v25 = vsub.f32 %v3394_v50, %v1052_v59 }
 0x4c1   : > { %2904 = vpow2.f32 %v1061_v23  ;;  %v1067_v46 = vmul.f32 1.442695, %v1056_v20  ;;  %v1737_v49 = vmax.f32 %v1735_v30, %v1736_v51  ;;  %v1071_v32 = vmul.f32 1.442695, %v1058_v7 }
 0x4c2   : > { %2906 = vpow2.f32 %v1065_v24  ;;  %v1005_v58 = vmul.f32 1.442695, %v990_v53  ;;  %v1008_v50 = vadd.f32 %v3451_v43, %v1007_v0  ;;  %v1075_v60 = vmul.f32 1.442695, %v1060_v25 }
 0x4c3   : > { %2908 = vpow2.f32 %v1069_v37  ;;  %v1016_v2 = vadd.f32 %v3462_v9, %v3460_v48  ;;  %v1747_v3 = vsub.f32 %v3324_v33, %v1737_v49  ;;  %v1749_v12 = vsub.f32 %v3328_v35, %v1737_v49 }
 0x4c4   : > { %2910 = vpow2.f32 %v1073_v63  ;;  %v3464_v22 = vpop.f32.mrf.mxu1  ;;  %v3466_v29 = vpop.f32.mrf.mxu2  ;;  %v1009_v11 = vadd.f32 %v3455_v45, %v1008_v50  ;;  %v1751_v28 = vsub.f32 %v3335_v38, %v1737_v49  ;;  %v3497_v62 = vmax.f32 %v1744_v27, %v1745_v4 }
 0x4c5   : > { %2912 = vpow2.f32 %v1063_v52  ;;  %v1799_v33 = vmax.f32 %v3419_v54, %v3464_v22  ;;  %v1808_v14 = vmax.f32 %v3421_v55, %v3466_v29  ;;  %v1017_v59 = vadd.f32 %v3468_v57, %v1016_v2 }
 0x4c6   : > { %2914 = vpow2.f32 %v1067_v46  ;;  %v1755_v30 = vmul.f32 1.442695, %v1747_v3  ;;  %v1105_v38 = vperm.slane %v3078_v8, 0  ;;  %v1010_v23 = vrot.slane %v1009_v11, 4 }
 0x4c7   : > { %v3471_v31 = vpop.eup %2904  ;;  %2916 = vpow2.f32 %v1071_v32  ;;  %v1753_v24 = vsub.f32 %v3344_v41, %v1737_v49  ;;  %v1759_v37 = vmul.f32 1.442695, %v1749_v12  ;;  %v1763_v25 = vmul.f32 1.442695, %v1751_v28 }
 0x4c8   : > { %v3473_v61 = vpop.eup %2906  ;;  %2918 = vpow2.f32 %v1005_v58  ;;  %v1748_v46 = vsub.f32 %v3326_v34, %v3497_v62  ;;  %v1011_v58 = vadd.f32 %v1010_v23, %v1009_v11  ;;  %v1752_v34 = vsub.f32 %v3337_v39, %v3497_v62 }
 0x4c9   : > { %v3478_v5 = vpop.eup %2908  ;;  %v1077_v6 = vadd.f32 %v3473_v61, %v3471_v31  ;;  %2920 = vpow2.f32 %v1075_v60  ;;  %v1767_v50 = vmul.f32 1.442695, %v1753_v24  ;;  %v1750_v60 = vsub.f32 %v3330_v36, %v3497_v62 }
 0x4ca   : > { %v3482_v10 = vpop.eup %2910  ;;  %2922 = vpow2.f32 %v1755_v30  ;;  %v1106_v30 = vperm.slane %v3078_v8, 4  ;;  %v1754_v39 = vsub.f32 %v3346_v42, %v3497_v62 }
 0x4cb   : > { %v3486_v13 = vpop.eup %2912  ;;  %v1078_v26 = vadd.f32 %v3478_v5, %v1077_v6  ;;  %2924 = vpow2.f32 %v1759_v37  ;;  %v1761_v36 = vmul.f32 1.442695, %v1750_v60 }
 0x4cc   : > { %v3493_v15 = vpop.eup %2914  ;;  %v3499_v35 = vpop.f32.mrf.mxu1  ;;  %2926 = vpow2.f32 %v1763_v25 }
 0x4cd   : > { %v3501_v56 = vpop.f32.mrf.mxu2  ;;  %v1079_v1 = vadd.f32 %v3482_v10, %v1078_v26  ;;  %v1086_v16 = vadd.f32 %v3493_v15, %v3486_v13  ;;  %v1800_v18 = vmax.f32 %v3434_v44, %v3499_v35  ;;  %v3510_v20 = vpop.eup %2916  ;;  %v1757_v26 = vmul.f32 1.442695, %v1748_v46 }
 0x4ce   : > { %v1809_v19 = vmax.f32 %v3436_v47, %v3501_v56  ;;  %v3514_v51 = vpop.eup %2918  ;;  %2928 = vpow2.f32 %v1767_v50 }
 0x4cf   : > { %v1080_v40 = vrot.slane %v1079_v1, 4  ;;  %v1087_v63 = vadd.f32 %v3510_v20, %v1086_v16  ;;  %v1801_v7 = vmax.f32 %v1799_v33, %v1800_v18  ;;  %v3517_v52 = vpop.eup %2920  ;;  %v1018_v0 = vadd.f32 %v3514_v51, %v1017_v59 }
 0x4d0   : > { %v1810_v53 = vmax.f32 %v1808_v14, %v1809_v19  ;;  %v3527_v11 = vpop.eup %2922  ;;  %2930 = vpow2.f32 %v1757_v26 }
 0x4d1   : > { %v1081_v27 = vadd.f32 %v1080_v40, %v1079_v1  ;;  %v1088_v41 = vadd.f32 %v3517_v52, %v1087_v63  ;;  %v1802_v49 = vrot.slane %v1801_v7, 4  ;;  %v1019_v12 = vrot.slane %v1018_v0, 4  ;;  %v3530_v24 = vpop.eup %2924 }
 0x4d2   : > { %v1811_v32 = vrot.slane %v1810_v53, 4  ;;  %v1012_v1 = vrot.slane %v1011_v58, 2  ;;  %v1765_v40 = vmul.f32 1.442695, %v1752_v34  ;;  %v3534_v46 = vpop.eup %2926  ;;  %2932 = vpow2.f32 %v1761_v36 }
 0x4d3   : > { %v1082_v2 = vrot.slane %v1081_v27, 2  ;;  %v1089_v3 = vrot.slane %v1088_v41, 4  ;;  %v1803_v4 = vmax.f32 %v1801_v7, %v1802_v49  ;;  %v1020_v37 = vadd.f32 %v1019_v12, %v1018_v0 }
 0x4d4   : > { %v1812_v6 = vmax.f32 %v1810_v53, %v1811_v32  ;;  %v1564_v49 = vperm.slane %v3078_v8, 7  ;;  %v3540_v42 = vpop.eup %2928  ;;  %v1013_v62 = vadd.f32 %v1012_v1, %v1011_v58 }
 0x4d5   : > { %v1083_v33 = vadd.f32 %v1082_v2, %v1081_v27  ;;  %v1090_v14 = vadd.f32 %v1089_v3, %v1088_v41  ;;  %v1804_v59 = vrot.slane %v1803_v4, 2  ;;  %v3536_v27 = vperm.slane %v1105_v38, 0 }
 0x4d6   : > { %v1813_v28 = vrot.slane %v1812_v6, 2  ;;  %v1563_v41 = vperm.slane %v3078_v8, 3  ;;  %v1021_v60 = vrot.slane %v1020_v37, 2  ;;  %v1769_v2 = vmul.f32 1.442695, %v1754_v39  ;;  %v3545_v12 = vpop.eup %2930 }
 0x4d7   : > { %v1084_v16 = vrot.slane %v1083_v33, 1  ;;  %v1091_v18 = vrot.slane %v1090_v14, 2  ;;  %v1805_v19 = vmax.f32 %v1803_v4, %v1804_v59 }
 0x4d8   : > { %v1814_v23 = vmax.f32 %v1812_v6, %v1813_v28  ;;  %v3551_v1 = vpop.eup %2932 }
 0x4d9   : > { %v1085_v63 = vadd.f32 %v1084_v16, %v1083_v33  ;;  %v1092_v7 = vadd.f32 %v1091_v18, %v1090_v14  ;;  %v1806_v53 = vrot.slane %v1805_v19, 1 }
 0x4da   : > { %v1815_v25 = vrot.slane %v1814_v23, 1 }
 0x4db   : > { %2934 = vrcp.f32 %v1085_v63  ;;  %v1093_v0 = vrot.slane %v1092_v7, 1  ;;  %v1807_v32 = vmax.f32 %v1805_v19, %v1806_v53  ;;  %v3563_v19 = vperm.slane %v1564_v49, 3 }
 0x4dc   : > { %v1816_v50 = vmax.f32 %v1814_v23, %v1815_v25  ;;  %2936 = vpow2.f32 %v1765_v40  ;;  %v1014_v23 = vrot.slane %v1013_v62, 1  ;;  %v1771_v49 = vadd.f32 %v3530_v24, %v3527_v11 }
 0x4dd   : > { %v1094_v3 = vadd.f32 %v1093_v0, %v1092_v7  ;;  %v1817_v4 = vsub.f32 %v3419_v54, %v1807_v32  ;;  %v1819_v38 = vsub.f32 %v3434_v44, %v1807_v32  ;;  %v1821_v6 = vsub.f32 %v3464_v22, %v1807_v32 }
 0x4de   : > { %v1823_v34 = vsub.f32 %v3499_v35, %v1807_v32  ;;  %v1818_v26 = vsub.f32 %v3421_v55, %v1816_v50  ;;  %v1820_v33 = vsub.f32 %v3436_v47, %v1816_v50  ;;  %v1822_v58 = vsub.f32 %v3466_v29, %v1816_v50 }
 0x4df   : > { %2938 = vrcp.f32 %v1094_v3  ;;  %v1825_v14 = vmul.f32 1.442695, %v1817_v4  ;;  %v1829_v59 = vmul.f32 1.442695, %v1819_v38  ;;  %v1833_v28 = vmul.f32 1.442695, %v1821_v6 }
 0x4e0   : > { %v3553_v54 = vperm.slane %v1563_v41, 3  ;;  %2940 = vpow2.f32 %v1769_v2  ;;  %v1837_v44 = vmul.f32 1.442695, %v1823_v34  ;;  %v1824_v22 = vsub.f32 %v3501_v56, %v1816_v50 }
 0x4e1   : > { %v2935_v36 = vpop.eup %2934  ;;  %v3556_v35 = vperm.slane %v1106_v30, 0  ;;  %2942 = vpow2.f32 %v1825_v14  ;;  %v1827_v55 = vmul.f32 1.442695, %v1818_v26  ;;  %v1022_v29 = vadd.f32 %v1021_v60, %v1020_v37 }
 0x4e2   : > { %v3558_v47 = vpop.eup %2936  ;;  %v3561_v16 = vmul.f32 %v2935_v36, %v3482_v10  ;;  %2944 = vpow2.f32 %v1829_v59  ;;  %v1831_v18 = vmul.f32 1.442695, %v1820_v33  ;;  %v1835_v39 = vmul.f32 1.442695, %v1822_v58 }
 0x4e3   : > { %2946 = vpow2.f32 %v1833_v28  ;;  %v1839_v56 = vmul.f32 1.442695, %v1824_v22  ;;  %v3570_v10 = vmul.f32 %v2935_v36, %v3478_v5  ;;  %v1023_v7 = vrot.slane %v1022_v29, 1 }
 0x4e4   : > { %2948 = vpow2.f32 %v1837_v44  ;;  %v1117_v30 = vmul.f32 %v3536_v27, %v3561_v16  ;;  %v1575_v40 = vmul.f32 %v3553_v54, %v3561_v16  ;;  %v1015_v41 = vadd.f32 %v1014_v23, %v1013_v62 }
 0x4e5   : > { %v2939_v63 = vpop.eup %2938  ;;  %2950 = vpow2.f32 %v1827_v55  ;;  %v1780_v0 = vadd.f32 %v3551_v1, %v3545_v12  ;;  %v1115_v2 = vmul.f32 %v3536_v27, %v3570_v10  ;;  %v1573_v3 = vmul.f32 %v3553_v54, %v3570_v10 }
 0x4e6   : > { %v3572_v37 = vpop.eup %2940  ;;  %v3575_v53 = vmul.f32 %v2939_v63, %v3517_v52  ;;  %2952 = vpow2.f32 %v1831_v18  ;;  %1131 = vmatpush.xpose.msrb.mxu3 %v1117_v30  ;;  %1589 = vmatpush.xpose.msrb.mxu1 %v1575_v40  ;;  %v3590_v50 = vmul.f32 %v2939_v63, %v3510_v20  ;;  %v3601_v4 = vmul.f32 %v2935_v36, %v3473_v61 }
 0x4e7   : > { %v3577_v25 = vpop.eup %2942  ;;  %2954 = vpow2.f32 %v1835_v39  ;;  %v1185_v6 = vperm.slane %v3078_v8, 1  ;;  %v1186_v20 = vperm.slane %v3078_v8, 5  ;;  %v1024_v34 = vadd.f32 %v1023_v7, %v1022_v29 }
 0x4e8   : > { %v3583_v5 = vpop.eup %2944  ;;  %2956 = vpow2.f32 %v1839_v56  ;;  %v1118_v52 = vmul.f32 %v3556_v35, %v3575_v53  ;;  %v1576_v32 = vmul.f32 %v3563_v19, %v3575_v53  ;;  %v1772_v33 = vadd.f32 %v3534_v46, %v1771_v49 }
 0x4e9   : > { %v3592_v62 = vpop.eup %2946  ;;  %v1841_v60 = vadd.f32 %v3583_v5, %v3577_v25  ;;  %2958 = vrcp.f32 %v1015_v41  ;;  %v1781_v58 = vadd.f32 %v3558_v47, %v1780_v0  ;;  %v1116_v59 = vmul.f32 %v3556_v35, %v3590_v50 }
 0x4ea   : > { %v3603_v38 = vpop.eup %2948  ;;  %1160 = vmatpush.xpose.msrb.mxu0 %v1118_v52  ;;  %1618 = vmatpush.xpose.msrb.mxu2 %v1576_v32  ;;  %v1574_v28 = vmul.f32 %v3563_v19, %v3590_v50  ;;  %v3619_v44 = vmul.f32 %v2939_v63, %v3493_v15  ;;  %v3622_v22 = vmul.f32 %v2935_v36, %v3471_v31  ;;  %v3635_v15 = vperm.slane %v1185_v6, 1 }
 0x4eb   : > { %v3607_v26 = vpop.eup %2950  ;;  %v1842_v14 = vadd.f32 %v3592_v62, %v1841_v60  ;;  %1132 = vmatpush.xpose.msrb.mxu3 %v1115_v2  ;;  %1590 = vmatpush.xpose.msrb.mxu1 %v1573_v3  ;;  %v1113_v23 = vmul.f32 %v3536_v27, %v3601_v4  ;;  %v1571_v39 = vmul.f32 %v3553_v54, %v3601_v4  ;;  %2960 = vrcp.f32 %v1024_v34 }
 0x4ec   : > { %v3612_v61 = vpop.eup %2952  ;;  %v3637_v31 = vperm.slane %v1186_v20, 1  ;;  %v1773_v36 = vadd.f32 %v3540_v42, %v1772_v33  ;;  %v1782_v7 = vadd.f32 %v3572_v37, %v1781_v58  ;;  %v1114_v41 = vmul.f32 %v3556_v35, %v3619_v44 }
 0x4ed   : > { %v3624_v55 = vpop.eup %2954  ;;  %v1843_v29 = vadd.f32 %v3603_v38, %v1842_v14  ;;  %v1850_v18 = vadd.f32 %v3612_v61, %v3607_v26  ;;  %v1572_v49 = vmul.f32 %v3563_v19, %v3619_v44  ;;  %v3647_v0 = vmul.f32 %v2939_v63, %v3486_v13 }
 0x4ee   : > { %v3633_v56 = vpop.eup %2956  ;;  %1161 = vmatpush.xpose.msrb.mxu0 %v1116_v59  ;;  %1619 = vmatpush.xpose.msrb.mxu2 %v1574_v28  ;;  %v1111_v2 = vmul.f32 %v3536_v27, %v3622_v22  ;;  %v1569_v3 = vmul.f32 %v3553_v54, %v3622_v22  ;;  %v1197_v6 = vmul.f32 %v3635_v15, %v3561_v16  ;;  %v1774_v63 = vrot.slane %v1773_v36, 4 }
 0x4ef   : > { %v1844_v30 = vrot.slane %v1843_v29, 4  ;;  %v1851_v40 = vadd.f32 %v3624_v55, %v1850_v18  ;;  %1133 = vmatpush.xpose.msrb.mxu3 %v1113_v23  ;;  %1591 = vmatpush.xpose.msrb.mxu1 %v1571_v39  ;;  %v3649_v52 = vpop.eup %2958  ;;  %v1783_v33 = vrot.slane %v1782_v7, 4  ;;  %v1112_v58 = vmul.f32 %v3556_v35, %v3647_v0 }
 0x4f0   : > { %v1570_v14 = vmul.f32 %v3563_v19, %v3647_v0  ;;  %v3668_v18 = vmul.f32 %v3649_v52, %v3443_v17  ;;  %v1195_v23 = vmul.f32 %v3635_v15, %v3570_v10 }
 0x4f1   : > { %v1845_v32 = vadd.f32 %v1844_v30, %v1843_v29  ;;  %v1852_v60 = vadd.f32 %v3633_v56, %v1851_v40  ;;  %v3658_v13 = vpop.eup %2960  ;;  %v1198_v29 = vmul.f32 %v3637_v31, %v3575_v53 }
 0x4f2   : > { %1162 = vmatpush.xpose.msrb.mxu0 %v1114_v41  ;;  %1620 = vmatpush.xpose.msrb.mxu2 %v1572_v49  ;;  %v3675_v40 = vmul.f32 %v3658_v13, %v3460_v48  ;;  %v1775_v41 = vadd.f32 %v1774_v63, %v1773_v36  ;;  %v1784_v49 = vadd.f32 %v1783_v33, %v1782_v7 }
 0x4f3   : > { %v1846_v20 = vrot.slane %v1845_v32, 2  ;;  %v1853_v34 = vrot.slane %v1852_v60, 4  ;;  %1134 = vmatpush.xpose.msrb.mxu3 %v1111_v2  ;;  %1592 = vmatpush.xpose.msrb.mxu1 %v1569_v3  ;;  %v1193_v2 = vmul.f32 %v3635_v15, %v3601_v4  ;;  %v3686_v36 = vmul.f32 %v3649_v52, %v3448_v21 }
 0x4f4   : > { %v1776_v7 = vrot.slane %v1775_v41, 2  ;;  %v1785_v3 = vrot.slane %v1784_v49, 2  ;;  %v3695_v63 = vmul.f32 %v3658_v13, %v3462_v9 }
 0x4f5   : > { %v1847_v59 = vadd.f32 %v1846_v20, %v1845_v32  ;;  %v1854_v28 = vadd.f32 %v1853_v34, %v1852_v60  ;;  %v1196_v60 = vmul.f32 %v3637_v31, %v3590_v50  ;;  %v1194_v20 = vmul.f32 %v3637_v31, %v3619_v44 }
 0x4f6   : > { %1163 = vmatpush.xpose.msrb.mxu0 %v1112_v58  ;;  %1621 = vmatpush.xpose.msrb.mxu2 %v1570_v14  ;;  %v1191_v34 = vmul.f32 %v3635_v15, %v3622_v22  ;;  %v1777_v33 = vadd.f32 %v1776_v7, %v1775_v41  ;;  %v1786_v58 = vadd.f32 %v1785_v3, %v1784_v49 }
 0x4f7   : > { %1211 = vmatpush.xpose.msra.mxu3 %v1197_v6  ;;  %v1848_v39 = vrot.slane %v1847_v59, 1  ;;  %v1855_v30 = vrot.slane %v1854_v28, 2  ;;  %1593 = vmatmul.f32.vlgmr.msrb.gmra.mxu1 %v3668_v18  ;;  %v1192_v14 = vmul.f32 %v3637_v31, %v3647_v0  ;;  %v3714_v41 = vmul.f32 %v3649_v52, %v3451_v43  ;;  %v3732_v43 = vpop.f32.mrf.mxu2 }
 0x4f8   : > { %1135 = vmatmul.f32.vlgmr.msrb.gmra.mxu3 %v3668_v18  ;;  %v3753_v3 = vmul.f32 %v3649_v52, %v3455_v45 }
 0x4f9   : > { %v1849_v17 = vadd.f32 %v1848_v39, %v1847_v59  ;;  %v1856_v32 = vadd.f32 %v1855_v30, %v1854_v28  ;;  %1164 = vmatmul.f32.vlgmr.msrb.gmra.mxu0 %v3675_v40  ;;  %1622 = vmatmul.f32.vlgmr.msrb.gmra.mxu2 %v3675_v40  ;;  %v3702_v59 = vpop.f32.mrf.mxu1  ;;  %v1778_v39 = vrot.slane %v1777_v33, 1  ;;  %v1787_v30 = vrot.slane %v1786_v58, 1 }
 0x4fa   : > { %1240 = vmatpush.xpose.msra.mxu0 %v1198_v29 }
 0x4fb   : > { %1212 = vmatpush.xpose.msra.mxu3 %v1195_v23  ;;  %2962 = vrcp.f32 %v1849_v17  ;;  %v1857_v48 = vrot.slane %v1856_v32, 1 }
 0x4fd   : > { %v1858_v6 = vadd.f32 %v1857_v48, %v1856_v32  ;;  %v3730_v32 = vmul.f32 %v3658_v13, %v3468_v57 }
 0x4fe   : > { %1241 = vmatpush.xpose.msra.mxu0 %v1196_v60  ;;  %v1779_v60 = vadd.f32 %v1778_v39, %v1777_v33 }
 0x4ff   : > { %1213 = vmatpush.xpose.msra.mxu3 %v1193_v2  ;;  %2964 = vrcp.f32 %v1858_v6  ;;  %1596 = vmatmul.f32.gmra.mxu1 %v3686_v36  ;;  %v1788_v2 = vadd.f32 %v1787_v30, %v1786_v58  ;;  %v3767_v45 = vpop.f32.mrf.mxu2 }
 0x500   : > { %1138 = vmatmul.f32.gmra.mxu3 %v3686_v36  ;;  %2966 = vrcp.f32 %v1779_v60 }
 0x501   : > { %v2963_v21 = vpop.eup %2962  ;;  %1167 = vmatmul.f32.gmra.mxu0 %v3695_v63  ;;  %1625 = vmatmul.f32.gmra.mxu2 %v3695_v63  ;;  %2968 = vrcp.f32 %v1788_v2 }
 0x502   : > { %1242 = vmatpush.xpose.msra.mxu0 %v1194_v20  ;;  %v3705_v28 = vmul.f32 %v2963_v21, %v3603_v38  ;;  %v3708_v9 = vmul.f32 %v2963_v21, %v3592_v62  ;;  %v3725_v17 = vmul.f32 %v2963_v21, %v3583_v5  ;;  %v3740_v5 = vmul.f32 %v2963_v21, %v3577_v25 }
 0x503   : > { %1214 = vmatpush.xpose.msra.mxu3 %v1191_v34 }
 0x504   : > { %v1875_v29 = vmul.f32 %v3705_v28, %v3536_v27  ;;  %v1873_v38 = vmul.f32 %v3708_v9, %v3536_v27  ;;  %v1871_v48 = vmul.f32 %v3725_v17, %v3536_v27  ;;  %v1869_v6 = vmul.f32 %v3740_v5, %v3536_v27 }
 0x505   : > { %v2965_v23 = vpop.eup %2964 }
 0x506   : > { %1243 = vmatpush.xpose.msra.mxu0 %v1192_v14  ;;  %v3717_v49 = vmul.f32 %v2965_v23, %v3633_v56  ;;  %1889 = vmatpush.xpose.msra.mxu1 %v1875_v29  ;;  %v3722_v62 = vmul.f32 %v2965_v23, %v3624_v55  ;;  %v3742_v55 = vpop.f32.mrf.mxu1  ;;  %v3749_v7 = vmul.f32 %v2965_v23, %v3612_v61  ;;  %v2967_v34 = vpop.eup %2966 }
 0x507   : > { %1599 = vmatmul.f32.gmra.mxu1 %v3714_v41  ;;  %v3760_v20 = vmul.f32 %v2965_v23, %v3607_v26  ;;  %v3765_v61 = vmul.f32 %v3658_v13, %v3514_v51  ;;  %v2969_v21 = vpop.eup %2968  ;;  %v3777_v51 = vmul.f32 %v2967_v34, %v3527_v11  ;;  %v3783_v33 = vpop.f32.mrf.mxu2  ;;  %v3791_v14 = vmul.f32 %v2967_v34, %v3530_v24 }
 0x508   : > { %1141 = vmatmul.f32.gmra.mxu3 %v3714_v41  ;;  %v1876_v56 = vmul.f32 %v3717_v49, %v3556_v35  ;;  %v1874_v57 = vmul.f32 %v3722_v62, %v3556_v35  ;;  %v1872_v25 = vmul.f32 %v3749_v7, %v3556_v35  ;;  %v3781_v13 = vmul.f32 %v2969_v21, %v3545_v12 }
 0x509   : > { %1170 = vmatmul.f32.gmra.mxu0 %v3730_v32  ;;  %1628 = vmatmul.f32.gmra.mxu2 %v3730_v32  ;;  %v1870_v26 = vmul.f32 %v3760_v20, %v3556_v35  ;;  %4317 = vst [vmem:[#allocation5_spill] sm:$0xff] %v3777_v51  ;;  %v3795_v11 = vmul.f32 %v2969_v21, %v3551_v1 }
 0x50a   : > { %1918 = vmatpush.xpose.msra.mxu2 %v1876_v56  ;;  %1890 = vmatpush.xpose.msra.mxu1 %v1873_v38  ;;  %4318 = vst [vmem:[#allocation6_spill] sm:$0xff] %v3781_v13  ;;  %v3805_v23 = vmul.f32 %v2967_v34, %v3534_v46  ;;  %v3809_v24 = vmul.f32 %v2969_v21, %v3558_v47 }
 0x50b   : > { %4319 = vst [vmem:[#allocation7_spill] sm:$0xff] %v3791_v14  ;;  %v3819_v30 = vmul.f32 %v2967_v34, %v3540_v42  ;;  %v3823_v46 = vmul.f32 %v2969_v21, %v3572_v37  ;;  %v1405_v37 = vperm.slane %v3078_v8, 2  ;;  %v1406_v34 = vperm.slane %v3078_v8, 6 }
 0x50c   : > { %4320 = vst [vmem:[#allocation8_spill] sm:$0xff] %v3795_v11 }
 0x50d   : > { %4321 = vst [vmem:[#allocation9_spill] sm:$0xff] %v3805_v23 }
 0x50e   : > { %1919 = vmatpush.xpose.msra.mxu2 %v1874_v57  ;;  %1891 = vmatpush.xpose.msra.mxu1 %v1871_v48  ;;  %v3772_v52 = vpop.f32.mrf.mxu1  ;;  %4322 = vst [vmem:[#allocation10_spill] sm:$0xff] %v3809_v24 }
 0x50f   : > { %1602 = vmatmul.f32.gmra.mxu1 %v3753_v3  ;;  %v3797_v12 = vpop.f32.mrf.mxu2  ;;  %4323 = vst [vmem:[#allocation11_spill] sm:$0xff] %v3819_v30  ;;  %v1261_v42 = vmul.f32 %v3635_v15, %v3772_v52 }
 0x510   : > { %1144 = vmatmul.f32.gmra.mxu3 %v3753_v3  ;;  %4324 = vst [vmem:[#allocation12_spill] sm:$0xff] %v3823_v46 }
 0x511   : > { %1173 = vmatmul.f32.gmra.mxu0 %v3765_v61  ;;  %1631 = vmatmul.f32.gmra.mxu2 %v3765_v61 }
 0x512   : > { %1920 = vmatpush.xpose.msra.mxu2 %v1872_v25  ;;  %1892 = vmatpush.xpose.msra.mxu1 %v1869_v6  ;;  %v3847_v6 = vperm.slane %v1405_v37, 2 }
 0x514   : > { %v2161_v8 = vmul.f32 %v3708_v9, %v3847_v6 }
 0x516   : > { %1921 = vmatpush.xpose.msra.mxu2 %v1870_v26  ;;  %v3788_v58 = vpop.f32.mrf.mxu1 }
 0x517   : > { %1893 = vmatmul.f32.vlgmr.msra.gmra.mxu1 %v3777_v51  ;;  %v3811_v1 = vpop.f32.mrf.mxu2  ;;  %v1263_v56 = vmul.f32 %v3635_v15, %v3788_v58 }
 0x518   : > { %1215 = vmatmul.f32.vlgmr.msra.gmra.mxu3 %v3668_v18 }
 0x519   : > { %1244 = vmatmul.f32.vlgmr.msra.gmra.mxu0 %v3675_v40  ;;  %1922 = vmatmul.f32.vlgmr.msra.gmra.mxu2 %v3781_v13  ;;  %v1415_v13 = vmul.f32 %v3847_v6, %v3570_v10 }
 0x51a   : > { %1289 = vmatpush.msrb.mxu3 %v1263_v56  ;;  %v2163_v56 = vmul.f32 %v3705_v28, %v3847_v6 }
 0x51c   : > { %1290 = vmatpush.msrb.mxu3 %v1261_v42 }
 0x51e   : > { %v3802_v29 = vpop.f32.mrf.mxu1 }
 0x51f   : > { %1896 = vmatmul.f32.gmra.mxu1 %v3791_v14  ;;  %v3825_v47 = vpop.f32.mrf.mxu2  ;;  %v2009_v26 = vmul.f32 %v3635_v15, %v3802_v29 }
 0x520   : > { %1218 = vmatmul.f32.gmra.mxu3 %v3686_v36  ;;  %v2012_v37 = vmul.f32 %v3637_v31, %v3825_v47 }
 0x521   : > { %1247 = vmatmul.f32.gmra.mxu0 %v3695_v63  ;;  %1925 = vmatmul.f32.gmra.mxu2 %v3795_v11 }
 0x526   : > { %v3816_v39 = vpop.f32.mrf.mxu1 }
 0x527   : > { %1899 = vmatmul.f32.gmra.mxu1 %v3805_v23  ;;  %v3836_v60 = vpop.f32.mrf.mxu2  ;;  %v2011_v25 = vmul.f32 %v3635_v15, %v3816_v39 }
 0x528   : > { %1221 = vmatmul.f32.gmra.mxu3 %v3714_v41 }
 0x529   : > { %1250 = vmatmul.f32.gmra.mxu0 %v3730_v32  ;;  %1928 = vmatmul.f32.gmra.mxu2 %v3809_v24 }
 0x52e   : > { %v3830_v38 = vpop.f32.mrf.mxu1 }
 0x52f   : > { %1902 = vmatmul.f32.gmra.mxu1 %v3819_v30  ;;  %v2013_v48 = vmul.f32 %v3635_v15, %v3830_v38  ;;  %v3852_v21 = vpop.f32.mrf.mxu2 }
 0x530   : > { %1224 = vmatmul.f32.gmra.mxu3 %v3753_v3  ;;  %v2016_v42 = vmul.f32 %v3637_v31, %v3852_v21 }
 0x531   : > { %1253 = vmatmul.f32.gmra.mxu0 %v3765_v61  ;;  %1931 = vmatmul.f32.gmra.mxu2 %v3823_v46 }
 0x532   : > { %2070 = vmatpush.msrb.mxu2 %v2016_v42 }
 0x536   : > { %v3839_v2 = vpop.f32.mrf.mxu1 }
 0x537   : > { %v2015_v57 = vmul.f32 %v3635_v15, %v3839_v2 }
 0x539   : > { %2041 = vmatpush.msrb.mxu1 %v2015_v57  ;;  %v2014_v57 = vmul.f32 %v3637_v31, %v3836_v60 }
 0x53b   : > { %2042 = vmatpush.msrb.mxu1 %v2013_v48  ;;  %v3862_v48 = vperm.slane %v1406_v34, 2  ;;  %2071 = vmatpush.msrb.mxu2 %v2014_v57 }
 0x53d   : > { %2043 = vmatpush.msrb.mxu1 %v2011_v25  ;;  %v2010_v25 = vmul.f32 %v3637_v31, %v3811_v1  ;;  %v2164_v46 = vmul.f32 %v3717_v49, %v3862_v48  ;;  %2072 = vmatpush.msrb.mxu2 %v2012_v37  ;;  %v2162_v34 = vmul.f32 %v3722_v62, %v3862_v48 }
 0x53e   : > { %v2160_v42 = vmul.f32 %v3749_v7, %v3862_v48  ;;  %v2158_v57 = vmul.f32 %v3760_v20, %v3862_v48  ;;  %v1257_v37 = vmul.f32 %v3635_v15, %v3702_v59  ;;  %v1416_v51 = vmul.f32 %v3862_v48, %v3590_v50 }
 0x53f   : > { %2044 = vmatpush.msrb.mxu1 %v2009_v26  ;;  %v2159_v26 = vmul.f32 %v3725_v17, %v3847_v6  ;;  %2073 = vmatpush.msrb.mxu2 %v2010_v25  ;;  %v1183_v25 = vmul.f32 %v3536_v27, %v3788_v58  ;;  %v1411_v50 = vmul.f32 %v3847_v6, %v3622_v22 }
 0x540   : > { %v1483_v22 = vmul.f32 %v3847_v6, %v3788_v58 }
 0x541   : > { %2177 = vmatpush.xpose.msra.mxu1 %v2163_v56  ;;  %2206 = vmatpush.xpose.msra.mxu2 %v2164_v46  ;;  %v2157_v56 = vmul.f32 %v3740_v5, %v3847_v6  ;;  %v1259_v46 = vmul.f32 %v3635_v15, %v3742_v55 }
 0x543   : > { %1291 = vmatpush.msrb.mxu3 %v1259_v46  ;;  %v1177_v46 = vmul.f32 %v3536_v27, %v3702_v59 }
 0x545   : > { %2178 = vmatpush.xpose.msra.mxu1 %v2161_v8  ;;  %2207 = vmatpush.xpose.msra.mxu2 %v2162_v34  ;;  %v1264_v8 = vmul.f32 %v3637_v31, %v3797_v12  ;;  %v1181_v34 = vmul.f32 %v3536_v27, %v3772_v52 }
 0x546   : > { %1292 = vmatpush.msrb.mxu3 %v1257_v37  ;;  %v1184_v37 = vmul.f32 %v3556_v35, %v3797_v12 }
 0x547   : > { %1318 = vmatpush.msrb.mxu0 %v1264_v8  ;;  %v1182_v8 = vmul.f32 %v3556_v35, %v3783_v33 }
 0x548   : > { %1359 = vmatpush.msra.mxu3 %v1183_v25  ;;  %v1180_v25 = vmul.f32 %v3556_v35, %v3767_v45 }
 0x549   : > { %2179 = vmatpush.xpose.msra.mxu1 %v2159_v26  ;;  %2208 = vmatpush.xpose.msra.mxu2 %v2160_v42  ;;  %v1262_v26 = vmul.f32 %v3637_v31, %v3783_v33  ;;  %v1179_v42 = vmul.f32 %v3536_v27, %v3742_v55 }
 0x54a   : > { %1360 = vmatpush.msra.mxu3 %v1181_v34 }
 0x54b   : > { %1319 = vmatpush.msrb.mxu0 %v1262_v26  ;;  %v1178_v26 = vmul.f32 %v3556_v35, %v3732_v43 }
 0x54c   : > { %1361 = vmatpush.msra.mxu3 %v1179_v42 }
 0x54d   : > { %2180 = vmatpush.xpose.msra.mxu1 %v2157_v56  ;;  %2209 = vmatpush.xpose.msra.mxu2 %v2158_v57  ;;  %v1260_v56 = vmul.f32 %v3637_v31, %v3767_v45  ;;  %v1258_v57 = vmul.f32 %v3637_v31, %v3732_v43 }
 0x54e   : > { %1362 = vmatpush.msra.mxu3 %v1177_v46 }
 0x54f   : > { %1320 = vmatpush.msrb.mxu0 %v1260_v56 }
 0x551   : > { %1321 = vmatpush.msrb.mxu0 %v1258_v57 }
 0x553   : > { %1388 = vmatpush.msra.mxu0 %v1184_v37 }
 0x555   : > { %1389 = vmatpush.msra.mxu0 %v1182_v8  ;;  %v1417_v8 = vmul.f32 %v3847_v6, %v3561_v16 }
 0x557   : > { %1390 = vmatpush.msra.mxu0 %v1180_v25  ;;  %v1418_v25 = vmul.f32 %v3862_v48, %v3575_v53  ;;  %v1413_v53 = vmul.f32 %v3847_v6, %v3601_v4 }
 0x559   : > { %1391 = vmatpush.msra.mxu0 %v1178_v26 }
 0x576   : > { %v1165_v34 = vpop.f32.mrf.mxu0 }
 0x57b   : > { %v1136_v30 = vpop.f32.mrf.mxu3 }
 0x57e   : > { %v1168_v24 = vpop.f32.mrf.mxu0 }
 0x583   : > { %v1139_v56 = vpop.f32.mrf.mxu3 }
 0x586   : > { %v1171_v42 = vpop.f32.mrf.mxu0 }
 0x58b   : > { %v1142_v23 = vpop.f32.mrf.mxu3 }
 0x58e   : > { %v3908_v11 = vpop.f32.mrf.mxu0 }
 0x593   : > { %v1145_v57 = vpop.f32.mrf.mxu3 }
 0x596   : > { %v1245_v46 = vpop.f32.mrf.mxu0 }
 0x59b   : > { %v1216_v37 = vpop.f32.mrf.mxu3 }
 0x59c   : > { %v1246_v14 = vadd.f32 %v1245_v46, %v1216_v37  ;;  %v1414_v37 = vmul.f32 %v3862_v48, %v3619_v44 }
 0x59e   : > { %2776 = vmatmul.msk.f32.vlgmr.msrb.gmra.mxu3 %vm332_vm0, %v1246_v14  ;;  %2780 = vmatmul.msk.f32.vlgmr.msrb.gmra.mxu0 %vm332_vm0, %v1246_v14  ;;  %v1248_v26 = vpop.f32.mrf.mxu0 }
 0x59f   : > { %1431 = vmatpush.xpose.msrb.mxu3 %v1417_v8  ;;  %1460 = vmatpush.xpose.msrb.mxu0 %v1418_v25  ;;  %v1166_v25 = vadd.f32 %v1165_v34, %v1136_v30  ;;  %v1479_v30 = vmul.f32 %v3847_v6, %v3742_v55  ;;  %v1480_v34 = vmul.f32 %v3862_v48, %v3767_v45 }
 0x5a3   : > { %1432 = vmatpush.xpose.msrb.mxu3 %v1415_v13  ;;  %1461 = vmatpush.xpose.msrb.mxu0 %v1416_v51  ;;  %v1219_v46 = vpop.f32.mrf.mxu3  ;;  %v1412_v51 = vmul.f32 %v3862_v48, %v3647_v0  ;;  %v1484_v0 = vmul.f32 %v3862_v48, %v3797_v12 }
 0x5a4   : > { %v1249_v16 = vadd.f32 %v1248_v26, %v1219_v46  ;;  %v1481_v26 = vmul.f32 %v3847_v6, %v3772_v52  ;;  %v1482_v46 = vmul.f32 %v3862_v48, %v3783_v33 }
 0x5a6   : > { %2777 = vmatmul.msk.f32.gmra.mxu3 %vm332_vm0, %v1249_v16  ;;  %2781 = vmatmul.msk.f32.gmra.mxu0 %vm332_vm0, %v1249_v16  ;;  %v1251_v10 = vpop.f32.mrf.mxu0  ;;  %v1477_v16 = vmul.f32 %v3847_v6, %v3702_v59 }
 0x5a7   : > { %1433 = vmatpush.xpose.msrb.mxu3 %v1413_v53  ;;  %1462 = vmatpush.xpose.msrb.mxu0 %v1414_v37  ;;  %v1478_v53 = vmul.f32 %v3862_v48, %v3732_v43  ;;  %v1169_v37 = vadd.f32 %v1168_v24, %v1139_v56  ;;  %v1641_v24 = vmul.f32 %v3553_v54, %v3788_v58 }
 0x5a8   : > { %v1642_v56 = vmul.f32 %v3563_v19, %v3797_v12  ;;  %v1637_v58 = vmul.f32 %v3553_v54, %v3742_v55  ;;  %v1638_v12 = vmul.f32 %v3563_v19, %v3767_v45 }
 0x5ab   : > { %1434 = vmatpush.xpose.msrb.mxu3 %v1411_v50  ;;  %1463 = vmatpush.xpose.msrb.mxu0 %v1412_v51  ;;  %v1222_v13 = vpop.f32.mrf.mxu3  ;;  %v1175_v50 = vadd.f32 %v3908_v11, %v1145_v57  ;;  %v1640_v11 = vmul.f32 %v3563_v19, %v3783_v33 }
 0x5ac   : > { %v1252_v4 = vadd.f32 %v1251_v10, %v1222_v13  ;;  %v1172_v10 = vadd.f32 %v1171_v42, %v1142_v23  ;;  %v1639_v23 = vmul.f32 %v3553_v54, %v3772_v52 }
 0x5ae   : > { %2778 = vmatmul.msk.f32.gmra.mxu3 %vm332_vm0, %v1252_v4  ;;  %2782 = vmatmul.msk.f32.gmra.mxu0 %vm332_vm0, %v1252_v4  ;;  %v1254_v44 = vpop.f32.mrf.mxu0 }
 0x5b3   : > { %v1225_v14 = vpop.f32.mrf.mxu3 }
 0x5b4   : > { %v1255_v8 = vadd.f32 %v1254_v44, %v1225_v14 }
 0x5b6   : > { %2779 = vmatmul.msk.f32.gmra.mxu3 %vm332_vm0, %v1255_v8  ;;  %2783 = vmatmul.msk.f32.gmra.mxu0 %vm332_vm0, %v1255_v8  ;;  %v1949_v8 = vmul.f32 %v3705_v28, %v3635_v15 }
 0x5be   : > { %2784 = vmatmul.msk.f32.vlgmr.msra.gmra.mxu3 %vm332_vm0, %v1166_v25  ;;  %2788 = vmatmul.msk.f32.vlgmr.msra.gmra.mxu0 %vm332_vm0, %v1166_v25  ;;  %v1950_v25 = vmul.f32 %v3717_v49, %v3637_v31 }
 0x5bf   : > { %1509 = vmatpush.msra.mxu3 %v1483_v22  ;;  %1538 = vmatpush.msra.mxu0 %v1484_v0  ;;  %v1947_v0 = vmul.f32 %v3708_v9, %v3635_v15 }
 0x5c1   : > { %1510 = vmatpush.msra.mxu3 %v1481_v26  ;;  %1539 = vmatpush.msra.mxu0 %v1482_v46  ;;  %v1948_v26 = vmul.f32 %v3722_v62, %v3637_v31 }
 0x5c3   : > { %1511 = vmatpush.msra.mxu3 %v1479_v30  ;;  %1540 = vmatpush.msra.mxu0 %v1480_v34  ;;  %v1945_v34 = vmul.f32 %v3725_v17, %v3635_v15 }
 0x5c5   : > { %1512 = vmatpush.msra.mxu3 %v1477_v16  ;;  %1541 = vmatpush.msra.mxu0 %v1478_v53  ;;  %v1946_v16 = vmul.f32 %v3749_v7, %v3637_v31 }
 0x5c6   : > { %2785 = vmatmul.msk.f32.gmra.mxu3 %vm332_vm0, %v1169_v37  ;;  %2789 = vmatmul.msk.f32.gmra.mxu0 %vm332_vm0, %v1169_v37  ;;  %v1943_v37 = vmul.f32 %v3740_v5, %v3635_v15 }
 0x5ce   : > { %2786 = vmatmul.msk.f32.gmra.mxu3 %vm332_vm0, %v1172_v10  ;;  %2790 = vmatmul.msk.f32.gmra.mxu0 %vm332_vm0, %v1172_v10  ;;  %v1944_v10 = vmul.f32 %v3760_v20, %v3637_v31  ;;  %v1941_v31 = vmul.f32 %v3536_v27, %v3839_v2 }
 0x5d6   : > { %2787 = vmatmul.msk.f32.gmra.mxu3 %vm332_vm0, %v1175_v50  ;;  %2791 = vmatmul.msk.f32.gmra.mxu0 %vm332_vm0, %v1175_v50 }
 0x5de   : > { %1435 = vmatmul.f32.vlgmr.msrb.gmra.mxu3 %v3668_v18  ;;  %1464 = vmatmul.f32.vlgmr.msrb.gmra.mxu0 %v3675_v40  ;;  %v1635_v18 = vmul.f32 %v3553_v54, %v3702_v59  ;;  %v1636_v40 = vmul.f32 %v3563_v19, %v3732_v43 }
 0x5df   : > { %1667 = vmatpush.msrb.mxu3 %v1641_v24  ;;  %1696 = vmatpush.msrb.mxu0 %v1642_v56  ;;  %v1623_v56 = vpop.f32.mrf.mxu2 }
 0x5e1   : > { %1668 = vmatpush.msrb.mxu3 %v1639_v23  ;;  %1697 = vmatpush.msrb.mxu0 %v1640_v11 }
 0x5e3   : > { %1669 = vmatpush.msrb.mxu3 %v1637_v58  ;;  %1698 = vmatpush.msrb.mxu0 %v1638_v12  ;;  %v1594_v12 = vpop.f32.mrf.mxu1 }
 0x5e4   : > { %v1624_v15 = vadd.f32 %v1623_v56, %v1594_v12  ;;  %v2228_v56 = vmul.f32 %v3862_v48, %v3836_v60  ;;  %v2224_v12 = vmul.f32 %v3862_v48, %v3811_v1 }
 0x5e5   : > { %1670 = vmatpush.msrb.mxu3 %v1635_v18  ;;  %1699 = vmatpush.msrb.mxu0 %v1636_v40  ;;  %v1942_v40 = vmul.f32 %v3556_v35, %v3852_v21 }
 0x5e6   : > { %1438 = vmatmul.f32.gmra.mxu3 %v3686_v36  ;;  %1467 = vmatmul.f32.gmra.mxu0 %v3695_v63 }
 0x5e7   : > { %v1626_v18 = vpop.f32.mrf.mxu2 }
 0x5ee   : > { %1441 = vmatmul.f32.gmra.mxu3 %v3714_v41  ;;  %1470 = vmatmul.f32.gmra.mxu0 %v3730_v32 }
 0x5f6   : > { %1444 = vmatmul.f32.gmra.mxu3 %v3753_v3  ;;  %1473 = vmatmul.f32.gmra.mxu0 %v3765_v61 }
 0x61b   : > { %v3983_v55 = vpop.f32.mrf.mxu0 }
 0x621   : > { %v3985_v59 = vpop.f32.mrf.mxu3 }
 0x623   : > { %v3987_v45 = vpop.f32.mrf.mxu0 }
 0x629   : > { %v3989_v43 = vpop.f32.mrf.mxu3 }
 0x62b   : > { %v3991_v52 = vpop.f32.mrf.mxu0 }
 0x631   : > { %v3993_v36 = vpop.f32.mrf.mxu3 }
 0x633   : > { %v3995_v63 = vpop.f32.mrf.mxu0 }
 0x639   : > { %v3997_v41 = vpop.f32.mrf.mxu3 }
 0x63b   : > { %v3999_v32 = vpop.f32.mrf.mxu0 }
 0x641   : > { %v4001_v3 = vpop.f32.mrf.mxu3 }
 0x643   : > { %v4003_v61 = vpop.f32.mrf.mxu0 }
 0x649   : > { %v4005_v33 = vpop.f32.mrf.mxu3 }
 0x64b   : > { %v4007_v42 = vpop.f32.mrf.mxu0 }
 0x651   : > { %v4009_v57 = vpop.f32.mrf.mxu3 }
 0x653   : > { %v4011_v51 = vpop.f32.mrf.mxu0 }
 0x659   : > { %v4013_v13 = vpop.f32.mrf.mxu3 }
 0x65b   : > { %v1465_v4 = vpop.f32.mrf.mxu0 }
 0x661   : > { %v1436_v44 = vpop.f32.mrf.mxu3 }
 0x662   : > { %v1466_v14 = vadd.f32 %v1465_v4, %v1436_v44  ;;  %v1597_v4 = vpop.f32.mrf.mxu1  ;;  %v1939_v44 = vmul.f32 %v3536_v27, %v3830_v38 }
 0x663   : > { %v1468_v22 = vpop.f32.mrf.mxu0 }
 0x664   : > { %2792 = vmatmul.msk.f32.vlgmr.msra.gmra.mxu3 %vm332_vm0, %v1466_v14  ;;  %2796 = vmatmul.msk.f32.vlgmr.msra.gmra.mxu0 %vm332_vm0, %v1466_v14  ;;  %v1940_v14 = vmul.f32 %v3556_v35, %v3836_v60 }
 0x665   : > { %1963 = vmatpush.xpose.msra.mxu3 %v1949_v8  ;;  %1992 = vmatpush.xpose.msra.mxu0 %v1950_v25  ;;  %v1937_v8 = vmul.f32 %v3536_v27, %v3816_v39  ;;  %v1938_v25 = vmul.f32 %v3556_v35, %v3825_v47 }
 0x669   : > { %1964 = vmatpush.xpose.msra.mxu3 %v1947_v0  ;;  %1993 = vmatpush.xpose.msra.mxu0 %v1948_v26  ;;  %v1439_v46 = vpop.f32.mrf.mxu3  ;;  %v1936_v0 = vmul.f32 %v3556_v35, %v3811_v1  ;;  %v1627_v26 = vadd.f32 %v1626_v18, %v1597_v4  ;;  %v2229_v35 = vmul.f32 %v3847_v6, %v3839_v2  ;;  %v4328_v18 = vld [vmem:[#allocation8_spill] sm:$0xff] }
 0x66a   : > { %v1469_v30 = vadd.f32 %v1468_v22, %v1439_v46  ;;  %v1935_v22 = vmul.f32 %v3536_v27, %v3802_v29  ;;  %v1629_v46 = vpop.f32.mrf.mxu2 }
 0x66b   : > { %v1471_v53 = vpop.f32.mrf.mxu0 }
 0x66c   : > { %2793 = vmatmul.msk.f32.gmra.mxu3 %vm332_vm0, %v1469_v30  ;;  %2797 = vmatmul.msk.f32.gmra.mxu0 %vm332_vm0, %v1469_v30  ;;  %v1600_v30 = vpop.f32.mrf.mxu1 }
 0x66d   : > { %1965 = vmatpush.xpose.msra.mxu3 %v1945_v34  ;;  %1994 = vmatpush.xpose.msra.mxu0 %v1946_v16  ;;  %v1630_v34 = vadd.f32 %v1629_v46, %v1600_v30  ;;  %v2380_v46 = vmul.f32 %v3563_v19, %v3836_v60  ;;  %v2375_v30 = vmul.f32 %v3553_v54, %v3802_v29 }
 0x671   : > { %1966 = vmatpush.xpose.msra.mxu3 %v1943_v37  ;;  %1995 = vmatpush.xpose.msra.mxu0 %v1944_v10  ;;  %v1442_v50 = vpop.f32.mrf.mxu3  ;;  %v2230_v37 = vmul.f32 %v3862_v48, %v3852_v21  ;;  %v4325_v10 = vld [vmem:[#allocation5_spill] sm:$0xff] }
 0x672   : > { %v1472_v24 = vadd.f32 %v1471_v53, %v1442_v50  ;;  %v1632_v16 = vpop.f32.mrf.mxu2  ;;  %v4326_v50 = vld [vmem:[#allocation6_spill] sm:$0xff] }
 0x673   : > { %v1474_v23 = vpop.f32.mrf.mxu0 }
 0x674   : > { %2794 = vmatmul.msk.f32.gmra.mxu3 %vm332_vm0, %v1472_v24  ;;  %2798 = vmatmul.msk.f32.gmra.mxu0 %vm332_vm0, %v1472_v24  ;;  %v1603_v53 = vpop.f32.mrf.mxu1  ;;  %v2227_v24 = vmul.f32 %v3847_v6, %v3830_v38 }
 0x675   : > { %v1633_v27 = vadd.f32 %v1632_v16, %v1603_v53 }
 0x679   : > { %v1445_v11 = vpop.f32.mrf.mxu3 }
 0x67a   : > { %v1475_v58 = vadd.f32 %v1474_v23, %v1445_v11  ;;  %v2225_v23 = vmul.f32 %v3847_v6, %v3816_v39  ;;  %v2226_v11 = vmul.f32 %v3862_v48, %v3825_v47  ;;  %v1923_v4 = vpop.f32.mrf.mxu2  ;;  %v2381_v48 = vmul.f32 %v3553_v54, %v3839_v2 }
 0x67b   : > { %v2377_v2 = vmul.f32 %v3553_v54, %v3816_v39 }
 0x67c   : > { %2795 = vmatmul.msk.f32.gmra.mxu3 %vm332_vm0, %v1475_v58  ;;  %2799 = vmatmul.msk.f32.gmra.mxu0 %vm332_vm0, %v1475_v58  ;;  %v2223_v58 = vmul.f32 %v3847_v6, %v3802_v29 }
 0x684   : > { %2800 = vmatmul.msk.f32.vlgmr.msrb.gmra.mxu3 %vm332_vm0, %v1624_v15  ;;  %2804 = vmatmul.msk.f32.vlgmr.msrb.gmra.mxu0 %vm332_vm0, %v1624_v15  ;;  %v4327_v15 = vld [vmem:[#allocation7_spill] sm:$0xff] }
 0x685   : > { %2111 = vmatpush.msrb.mxu3 %v1941_v31  ;;  %2140 = vmatpush.msrb.mxu0 %v1942_v40  ;;  %v4329_v31 = vld [vmem:[#allocation9_spill] sm:$0xff]  ;;  %v4330_v40 = vld [vmem:[#allocation10_spill] sm:$0xff] }
 0x687   : > { %2112 = vmatpush.msrb.mxu3 %v1939_v44  ;;  %2141 = vmatpush.msrb.mxu0 %v1940_v14  ;;  %v1894_v44 = vpop.f32.mrf.mxu1  ;;  %v4331_v14 = vld [vmem:[#allocation11_spill] sm:$0xff] }
 0x688   : > { %v1924_v6 = vadd.f32 %v1923_v4, %v1894_v44 }
 0x689   : > { %2113 = vmatpush.msrb.mxu3 %v1937_v8  ;;  %2142 = vmatpush.msrb.mxu0 %v1938_v25  ;;  %v4332_v8 = vld [vmem:[#allocation12_spill] sm:$0xff]  ;;  %v1926_v25 = vpop.f32.mrf.mxu2 }
 0x68b   : > { %2114 = vmatpush.msrb.mxu3 %v1935_v22  ;;  %2143 = vmatpush.msrb.mxu0 %v1936_v0  ;;  %v2382_v22 = vmul.f32 %v3563_v19, %v3852_v21  ;;  %v2378_v21 = vmul.f32 %v3563_v19, %v3825_v47 }
 0x68c   : > { %2801 = vmatmul.msk.f32.gmra.mxu3 %vm332_vm0, %v1627_v26  ;;  %2805 = vmatmul.msk.f32.gmra.mxu0 %vm332_vm0, %v1627_v26  ;;  %v2379_v26 = vmul.f32 %v3553_v54, %v3830_v38 }
 0x68f   : > { %v1897_v0 = vpop.f32.mrf.mxu1 }
 0x690   : > { %v1927_v38 = vadd.f32 %v1926_v25, %v1897_v0  ;;  %v1397_v25 = vadd.f32 %v4003_v61, %v3987_v45 }
 0x691   : > { %v1929_v60 = vpop.f32.mrf.mxu2 }
 0x694   : > { %2802 = vmatmul.msk.f32.gmra.mxu3 %vm332_vm0, %v1630_v34  ;;  %2806 = vmatmul.msk.f32.gmra.mxu0 %vm332_vm0, %v1630_v34  ;;  %v2376_v34 = vmul.f32 %v3563_v19, %v3811_v1 }
 0x697   : > { %v1900_v39 = vpop.f32.mrf.mxu1 }
 0x698   : > { %v1930_v16 = vadd.f32 %v1929_v60, %v1900_v39 }
 0x699   : > { %v1932_v47 = vpop.f32.mrf.mxu2 }
 0x69c   : > { %2803 = vmatmul.msk.f32.gmra.mxu3 %vm332_vm0, %v1633_v27  ;;  %2807 = vmatmul.msk.f32.gmra.mxu0 %vm332_vm0, %v1633_v27 }
 0x69f   : > { %v1903_v53 = vpop.f32.mrf.mxu1 }
 0x6a0   : > { %v1933_v29 = vadd.f32 %v1932_v47, %v1903_v53 }
 0x6a4   : > { %1967 = vmatmul.f32.vlgmr.msra.gmra.mxu3 %v4325_v10  ;;  %1996 = vmatmul.f32.vlgmr.msra.gmra.mxu0 %v4326_v50 }
 0x6a5   : > { %2255 = vmatpush.msra.mxu3 %v2229_v35  ;;  %2284 = vmatpush.msra.mxu0 %v2230_v37 }
 0x6a7   : > { %2256 = vmatpush.msra.mxu3 %v2227_v24  ;;  %2285 = vmatpush.msra.mxu0 %v2228_v56 }
 0x6a9   : > { %2257 = vmatpush.msra.mxu3 %v2225_v23  ;;  %2286 = vmatpush.msra.mxu0 %v2226_v11  ;;  %v1394_v11 = vadd.f32 %v3999_v32, %v3983_v55  ;;  %v1368_v55 = vadd.f32 %v4005_v33, %v3989_v43  ;;  %v1400_v32 = vadd.f32 %v4007_v42, %v3991_v52 }
 0x6ab   : > { %2258 = vmatpush.msra.mxu3 %v2223_v58  ;;  %2287 = vmatpush.msra.mxu0 %v2224_v12 }
 0x6ac   : > { %1970 = vmatmul.f32.gmra.mxu3 %v4327_v15  ;;  %1999 = vmatmul.f32.gmra.mxu0 %v4328_v18 }
 0x6b4   : > { %1973 = vmatmul.f32.gmra.mxu3 %v4329_v31  ;;  %2002 = vmatmul.f32.gmra.mxu0 %v4330_v40 }
 0x6bc   : > { %1976 = vmatmul.f32.gmra.mxu3 %v4331_v14  ;;  %2005 = vmatmul.f32.gmra.mxu0 %v4332_v8 }
 0x6c4   : > { %2816 = vmatmul.msk.f32.vlgmr.msrb.gmra.mxu3 %vm332_vm0, %v1924_v6  ;;  %2820 = vmatmul.msk.f32.vlgmr.msrb.gmra.mxu0 %vm332_vm0, %v1924_v6  ;;  %v1365_v6 = vadd.f32 %v4001_v3, %v3985_v59 }
 0x6c5   : > { %2407 = vmatpush.msrb.mxu3 %v2381_v48  ;;  %2436 = vmatpush.msrb.mxu0 %v2382_v22 }
 0x6c7   : > { %2408 = vmatpush.msrb.mxu3 %v2379_v26  ;;  %2437 = vmatpush.msrb.mxu0 %v2380_v46 }
 0x6c9   : > { %2409 = vmatpush.msrb.mxu3 %v2377_v2  ;;  %2438 = vmatpush.msrb.mxu0 %v2378_v21 }
 0x6cb   : > { %2410 = vmatpush.msrb.mxu3 %v2375_v30  ;;  %2439 = vmatpush.msrb.mxu0 %v2376_v34  ;;  %v1371_v34 = vadd.f32 %v4009_v57, %v3993_v36 }
 0x6cc   : > { %2817 = vmatmul.msk.f32.gmra.mxu3 %vm332_vm0, %v1927_v38  ;;  %2821 = vmatmul.msk.f32.gmra.mxu0 %vm332_vm0, %v1927_v38  ;;  %v1403_v38 = vadd.f32 %v4011_v51, %v3995_v63  ;;  %v2315_v63 = vmul.f32 %v3705_v28, %v3553_v54  ;;  %v2316_v51 = vmul.f32 %v3717_v49, %v3563_v19 }
 0x6cd   : > { %v2311_v49 = vmul.f32 %v3725_v17, %v3553_v54 }
 0x6d4   : > { %2818 = vmatmul.msk.f32.gmra.mxu3 %vm332_vm0, %v1930_v16  ;;  %2822 = vmatmul.msk.f32.gmra.mxu0 %vm332_vm0, %v1930_v16  ;;  %v1374_v16 = vadd.f32 %v4013_v13, %v3997_v41  ;;  %v2313_v41 = vmul.f32 %v3708_v9, %v3553_v54  ;;  %v2314_v13 = vmul.f32 %v3722_v62, %v3563_v19 }
 0x6d5   : > { %v2309_v62 = vmul.f32 %v3740_v5, %v3553_v54 }
 0x6dc   : > { %2819 = vmatmul.msk.f32.gmra.mxu3 %vm332_vm0, %v1933_v29  ;;  %2823 = vmatmul.msk.f32.gmra.mxu0 %vm332_vm0, %v1933_v29 }
 0x6e1   : > { %v1543_v1 = vpop.f32.mrf.mxu0 }
 0x6e2   : > { %v1556_v12 = vadd.f32 %v1543_v1, %v1394_v11 }
 0x6e7   : > { %v1514_v27 = vpop.f32.mrf.mxu3 }
 0x6e8   : > { %v1555_v48 = vadd.f32 %v1514_v27, %v1365_v6 }
 0x6e9   : > { %v1546_v35 = vpop.f32.mrf.mxu0 }
 0x6ea   : > { %v1558_v0 = vadd.f32 %v1546_v35, %v1397_v25 }
 0x6ef   : > { %v1517_v37 = vpop.f32.mrf.mxu3 }
 0x6f0   : > { %v1557_v21 = vadd.f32 %v1517_v37, %v1368_v55  ;;  %v2312_v37 = vmul.f32 %v3749_v7, %v3563_v19 }
 0x6f1   : > { %v1549_v24 = vpop.f32.mrf.mxu0 }
 0x6f2   : > { %v1560_v59 = vadd.f32 %v1549_v24, %v1400_v32  ;;  %v2310_v24 = vmul.f32 %v3760_v20, %v3563_v19 }
 0x6f7   : > { %v1520_v56 = vpop.f32.mrf.mxu3 }
 0x6f8   : > { %v1559_v60 = vadd.f32 %v1520_v56, %v1371_v34 }
 0x6f9   : > { %v1552_v23 = vpop.f32.mrf.mxu0 }
 0x6fa   : > { %v1562_v43 = vadd.f32 %v1552_v23, %v1403_v38 }
 0x6ff   : > { %v1523_v58 = vpop.f32.mrf.mxu3 }
 0x700   : > { %v1561_v47 = vadd.f32 %v1523_v58, %v1374_v16 }
 0x701   : > { %v1701_v4 = vpop.f32.mrf.mxu0 }
 0x702   : > { %v4113_v44 = vadd.f32 %v1701_v4, %v1556_v12 }
 0x707   : > { %v1672_v22 = vpop.f32.mrf.mxu3 }
 0x708   : > { %v4119_v26 = vadd.f32 %v1672_v22, %v1555_v48 }
 0x709   : > { %v1704_v46 = vpop.f32.mrf.mxu0 }
 0x70a   : > { %v4121_v2 = vadd.f32 %v1704_v46, %v1558_v0 }
 0x70f   : > { %v1675_v30 = vpop.f32.mrf.mxu3 }
 0x710   : > { %v4127_v3 = vadd.f32 %v1675_v30, %v1557_v21 }
 0x711   : > { %v1707_v45 = vpop.f32.mrf.mxu0 }
 0x712   : > { %v4129_v61 = vadd.f32 %v1707_v45, %v1560_v59 }
 0x717   : > { %v1678_v39 = vpop.f32.mrf.mxu3 }
 0x718   : > { %v4135_v33 = vadd.f32 %v1678_v39, %v1559_v60 }
 0x719   : > { %v1710_v52 = vpop.f32.mrf.mxu0 }
 0x71a   : > { %v4137_v42 = vadd.f32 %v1710_v52, %v1562_v43 }
 0x71f   : > { %v1681_v53 = vpop.f32.mrf.mxu3 }
 0x720   : > { %v4141_v29 = vadd.f32 %v1681_v53, %v1561_v47 }
 0x721   : > { %v1997_v1 = vpop.f32.mrf.mxu0 }
 0x727   : > { %v1968_v36 = vpop.f32.mrf.mxu3 }
 0x728   : > { %v1998_v57 = vadd.f32 %v1997_v1, %v1968_v36 }
 0x729   : > { %v2000_v27 = vpop.f32.mrf.mxu0 }
 0x72a   : > { %2808 = vmatmul.msk.f32.vlgmr.msrb.gmra.mxu1 %vm332_vm0, %v1998_v57  ;;  %2812 = vmatmul.msk.f32.vlgmr.msrb.gmra.mxu2 %vm332_vm0, %v1998_v57 }
 0x72b   : > { %2329 = vmatpush.xpose.msrb.mxu1 %v2315_v63  ;;  %2358 = vmatpush.xpose.msrb.mxu2 %v2316_v51 }
 0x72f   : > { %2330 = vmatpush.xpose.msrb.mxu1 %v2313_v41  ;;  %2359 = vmatpush.xpose.msrb.mxu2 %v2314_v13  ;;  %v1971_v35 = vpop.f32.mrf.mxu3 }
 0x730   : > { %v2001_v28 = vadd.f32 %v2000_v27, %v1971_v35 }
 0x731   : > { %v2003_v9 = vpop.f32.mrf.mxu0 }
 0x732   : > { %2809 = vmatmul.msk.f32.gmra.mxu1 %vm332_vm0, %v2001_v28  ;;  %2813 = vmatmul.msk.f32.gmra.mxu2 %vm332_vm0, %v2001_v28 }
 0x733   : > { %2331 = vmatpush.xpose.msrb.mxu1 %v2311_v49  ;;  %2360 = vmatpush.xpose.msrb.mxu2 %v2312_v37 }
 0x737   : > { %2332 = vmatpush.xpose.msrb.mxu1 %v2309_v62  ;;  %2361 = vmatpush.xpose.msrb.mxu2 %v2310_v24  ;;  %v1974_v56 = vpop.f32.mrf.mxu3 }
 0x738   : > { %v2004_v17 = vadd.f32 %v2003_v9, %v1974_v56 }
 0x739   : > { %v2006_v7 = vpop.f32.mrf.mxu0 }
 0x73a   : > { %2810 = vmatmul.msk.f32.gmra.mxu1 %vm332_vm0, %v2004_v17  ;;  %2814 = vmatmul.msk.f32.gmra.mxu2 %vm332_vm0, %v2004_v17  ;;  %v2497_v17 = vld [vmem:[#allocation2 + $0x88] sm:$0x1] }
 0x73f   : > { %v1977_v23 = vpop.f32.mrf.mxu3 }
 0x740   : > { %v2007_v11 = vadd.f32 %v2006_v7, %v1977_v23  ;;  %v2496_v7 = vld [vmem:[#allocation2 + $0x80] sm:$0x1] }
 0x741   : > { %v2145_v52 = vpop.f32.mrf.mxu0 }
 0x742   : > { %2811 = vmatmul.msk.f32.gmra.mxu1 %vm332_vm0, %v2007_v11  ;;  %2815 = vmatmul.msk.f32.gmra.mxu2 %vm332_vm0, %v2007_v11 }
 0x747   : > { %v2116_v16 = vpop.f32.mrf.mxu3 }
 0x749   : > { %v2148_v47 = vpop.f32.mrf.mxu0 }
 0x74a   : > { %2181 = vmatmul.f32.vlgmr.msra.gmra.mxu1 %v4325_v10  ;;  %2210 = vmatmul.f32.vlgmr.msra.gmra.mxu2 %v4326_v50 }
 0x74b   : > { %2845 = vmatpush.msk.msra.mxu2 %vm783_vm15, %v2497_v17  ;;  %2840 = vmatpush.msk.msra.mxu1 %vm783_vm15, %v2496_v7 }
 0x74f   : > { %v2119_v53 = vpop.f32.mrf.mxu3 }
 0x751   : > { %v2151_v1 = vpop.f32.mrf.mxu0 }
 0x752   : > { %2184 = vmatmul.f32.gmra.mxu1 %v4327_v15  ;;  %2213 = vmatmul.f32.gmra.mxu2 %v4328_v18 }
 0x757   : > { %v2122_v36 = vpop.f32.mrf.mxu3 }
 0x759   : > { %v2154_v57 = vpop.f32.mrf.mxu0 }
 0x75a   : > { %2187 = vmatmul.f32.gmra.mxu1 %v4329_v31  ;;  %2216 = vmatmul.f32.gmra.mxu2 %v4330_v40 }
 0x75f   : > { %v2125_v63 = vpop.f32.mrf.mxu3 }
 0x762   : > { %2190 = vmatmul.f32.gmra.mxu1 %v4331_v14  ;;  %2219 = vmatmul.f32.gmra.mxu2 %v4332_v8 }
 0x76a   : > { %2333 = vmatmul.f32.vlgmr.msrb.gmra.mxu1 %v4325_v10  ;;  %2362 = vmatmul.f32.vlgmr.msrb.gmra.mxu2 %v4326_v50 }
 0x772   : > { %2336 = vmatmul.f32.gmra.mxu1 %v4327_v15  ;;  %2365 = vmatmul.f32.gmra.mxu2 %v4328_v18 }
 0x77a   : > { %2339 = vmatmul.f32.gmra.mxu1 %v4329_v31  ;;  %2368 = vmatmul.f32.gmra.mxu2 %v4330_v40 }
 0x782   : > { %2342 = vmatmul.f32.gmra.mxu1 %v4331_v14  ;;  %2371 = vmatmul.f32.gmra.mxu2 %v4332_v8 }
 0x7a7   : > { %v4183_v54 = vpop.f32.mrf.mxu1 }
 0x7a8   : > { %v2117_v23 = vadd.f32 %v2116_v16, %v4183_v54 }
 0x7ad   : > { %v2075_v19 = vpop.f32.mrf.mxu2 }
 0x7ae   : > { %v2146_v37 = vadd.f32 %v2145_v52, %v2075_v19  ;;  %v2973_v52 = vld [vmem:[%s3086_s13 + $0x18] sm:$0xff] }
 0x7af   : > { %v4185_v5 = vpop.f32.mrf.mxu1 }
 0x7b5   : > { %v4187_v20 = vpop.f32.mrf.mxu2 }
 0x7b6   : > { %v2149_v11 = vadd.f32 %v2148_v47, %v4187_v20 }
 0x7b7   : > { %v4189_v10 = vpop.f32.mrf.mxu1 }
 0x7b8   : > { %v2123_v54 = vadd.f32 %v2122_v36, %v4189_v10  ;;  %v2476_v10 = vld [vmem:[%s4298_s4] sm:$0xff] }
 0x7bd   : > { %v4191_v50 = vpop.f32.mrf.mxu2 }
 0x7bf   : > { %v4193_v15 = vpop.f32.mrf.mxu1 }
 0x7c5   : > { %v4195_v18 = vpop.f32.mrf.mxu2 }
 0x7c6   : > { %v2155_v20 = vadd.f32 %v2154_v57, %v4195_v18  ;;  %v2975_v57 = vld [vmem:[%s3086_s13 + $0x28] sm:$0xff] }
 0x7c7   : > { %v2182_v31 = vpop.f32.mrf.mxu1 }
 0x7cd   : > { %v2211_v40 = vpop.f32.mrf.mxu2 }
 0x7ce   : > { %v2212_v14 = vadd.f32 %v2211_v40, %v2182_v31 }
 0x7cf   : > { %v2185_v58 = vpop.f32.mrf.mxu1 }
 0x7d0   : > { %2824 = vmatmul.msk.f32.vlgmr.msra.gmra.mxu3 %vm332_vm0, %v2212_v14  ;;  %2828 = vmatmul.msk.f32.vlgmr.msra.gmra.mxu0 %vm332_vm0, %v2212_v14 }
 0x7d5   : > { %v2214_v8 = vpop.f32.mrf.mxu2 }
 0x7d6   : > { %v2215_v12 = vadd.f32 %v2214_v8, %v2185_v58 }
 0x7d7   : > { %v2188_v4 = vpop.f32.mrf.mxu1 }
 0x7d8   : > { %2825 = vmatmul.msk.f32.gmra.mxu3 %vm332_vm0, %v2215_v12  ;;  %2829 = vmatmul.msk.f32.gmra.mxu0 %vm332_vm0, %v2215_v12  ;;  %v2120_v12 = vadd.f32 %v2119_v53, %v4185_v5  ;;  %v2126_v5 = vadd.f32 %v2125_v63, %v4193_v15 }
 0x7dd   : > { %v2217_v6 = vpop.f32.mrf.mxu2 }
 0x7de   : > { %v2218_v25 = vadd.f32 %v2217_v6, %v2188_v4  ;;  %v2152_v4 = vadd.f32 %v2151_v1, %v4191_v50  ;;  %v2974_v1 = vld [vmem:[%s3086_s13 + $0x20] sm:$0xff] }
 0x7df   : > { %v2191_v48 = vpop.f32.mrf.mxu1 }
 0x7e0   : > { %2826 = vmatmul.msk.f32.gmra.mxu3 %vm332_vm0, %v2218_v25  ;;  %2830 = vmatmul.msk.f32.gmra.mxu0 %vm332_vm0, %v2218_v25 }
 0x7e5   : > { %v2220_v22 = vpop.f32.mrf.mxu2 }
 0x7e6   : > { %v2221_v0 = vadd.f32 %v2220_v22, %v2191_v48 }
 0x7e7   : > { %v2334_v46 = vpop.f32.mrf.mxu1 }
 0x7e8   : > { %2827 = vmatmul.msk.f32.gmra.mxu3 %vm332_vm0, %v2221_v0  ;;  %2831 = vmatmul.msk.f32.gmra.mxu0 %vm332_vm0, %v2221_v0 }
 0x7ed   : > { %v2363_v55 = vpop.f32.mrf.mxu2 }
 0x7ee   : > { %v2364_v32 = vadd.f32 %v2363_v55, %v2334_v46 }
 0x7ef   : > { %v2337_v21 = vpop.f32.mrf.mxu1 }
 0x7f0   : > { %2832 = vmatmul.msk.f32.vlgmr.msrb.gmra.mxu3 %vm332_vm0, %v2364_v32  ;;  %2836 = vmatmul.msk.f32.vlgmr.msrb.gmra.mxu0 %vm332_vm0, %v2364_v32 }
 0x7f5   : > { %v2366_v30 = vpop.f32.mrf.mxu2 }
 0x7f6   : > { %v2367_v59 = vadd.f32 %v2366_v30, %v2337_v21 }
 0x7f7   : > { %v2340_v45 = vpop.f32.mrf.mxu1 }
 0x7f8   : > { %2833 = vmatmul.msk.f32.gmra.mxu3 %vm332_vm0, %v2367_v59  ;;  %2837 = vmatmul.msk.f32.gmra.mxu0 %vm332_vm0, %v2367_v59 }
 0x7fd   : > { %v2369_v34 = vpop.f32.mrf.mxu2 }
 0x7fe   : > { %v2370_v38 = vadd.f32 %v2369_v34, %v2340_v45 }
 0x7ff   : > { %v2343_v60 = vpop.f32.mrf.mxu1 }
 0x800   : > { %2834 = vmatmul.msk.f32.gmra.mxu3 %vm332_vm0, %v2370_v38  ;;  %2838 = vmatmul.msk.f32.gmra.mxu0 %vm332_vm0, %v2370_v38 }
 0x805   : > { %v2372_v39 = vpop.f32.mrf.mxu2 }
 0x806   : > { %v2373_v43 = vadd.f32 %v2372_v39, %v2343_v60  ;;  %v2972_v39 = vld [vmem:[%s3086_s13 + $0x10] sm:$0xff] }
 0x808   : > { %2835 = vmatmul.msk.f32.gmra.mxu3 %vm332_vm0, %v2373_v43  ;;  %2839 = vmatmul.msk.f32.gmra.mxu0 %vm332_vm0, %v2373_v43  ;;  %vm2498_vm0 = vcmask 531456  }
 0x84d   : > { %v2289_v51 = vpop.f32.mrf.mxu0 }
 0x84e   : > { %v2302_v62 = vadd.f32 %v2289_v51, %v2146_v37 }
 0x853   : > { %v2260_v27 = vpop.f32.mrf.mxu3 }
 0x854   : > { %v2301_v31 = vadd.f32 %v2260_v27, %v2117_v23 }
 0x855   : > { %v2292_v41 = vpop.f32.mrf.mxu0 }
 0x856   : > { %v2304_v14 = vadd.f32 %v2292_v41, %v2149_v11  ;;  %v2976_v41 = vld [vmem:[%s3086_s13 + $0x30] sm:$0xff] }
 0x85b   : > { %v2263_v13 = vpop.f32.mrf.mxu3 }
 0x85c   : > { %v2303_v6 = vadd.f32 %v2263_v13, %v2120_v12 }
 0x85d   : > { %v2295_v35 = vpop.f32.mrf.mxu0 }
 0x85e   : > { %v2306_v48 = vadd.f32 %v2295_v35, %v2152_v4  ;;  %v2977_v35 = vld [vmem:[%s3086_s13 + $0x38] sm:$0xff] }
 0x863   : > { %v2266_v28 = vpop.f32.mrf.mxu3 }
 0x864   : > { %v2305_v55 = vadd.f32 %v2266_v28, %v2123_v54 }
 0x865   : > { %v2298_v49 = vpop.f32.mrf.mxu0 }
 0x866   : > { %v2308_v21 = vadd.f32 %v2298_v49, %v2155_v20 }
 0x86b   : > { %v2269_v9 = vpop.f32.mrf.mxu3 }
 0x86c   : > { %v2307_v50 = vadd.f32 %v2269_v9, %v2126_v5 }
 0x86d   : > { %v2441_v24 = vpop.f32.mrf.mxu0 }
 0x86e   : > { %v2454_v56 = vadd.f32 %v2441_v24, %v2302_v62 }
 0x873   : > { %v2412_v40 = vpop.f32.mrf.mxu3 }
 0x874   : > { %v2453_v58 = vadd.f32 %v2412_v40, %v2301_v31 }
 0x875   : > { %v2444_v8 = vpop.f32.mrf.mxu0 }
 0x876   : > { %v2456_v19 = vadd.f32 %v2444_v8, %v2304_v14 }
 0x87b   : > { %v2415_v25 = vpop.f32.mrf.mxu3 }
 0x87c   : > { %v2455_v22 = vadd.f32 %v2415_v25, %v2303_v6 }
 0x87d   : > { %v2447_v0 = vpop.f32.mrf.mxu0 }
 0x87e   : > { %v2458_v46 = vadd.f32 %v2447_v0, %v2306_v48 }
 0x883   : > { %v2418_v32 = vpop.f32.mrf.mxu3 }
 0x884   : > { %v2457_v30 = vadd.f32 %v2418_v32, %v2305_v55 }
 0x885   : > { %v2450_v59 = vpop.f32.mrf.mxu0 }
 0x886   : > { %v2460_v45 = vadd.f32 %v2450_v59, %v2308_v21 }
 0x888   : > { %2554 = vmatpush.msra.mxu2 %v2460_v45 }
 0x88a   : > { %2555 = vmatpush.msra.mxu2 %v2458_v46 }
 0x88b   : > { %v2421_v34 = vpop.f32.mrf.mxu3 }
 0x88c   : > { %v2459_v38 = vadd.f32 %v2421_v34, %v2307_v50  ;;  %2556 = vmatpush.msra.mxu2 %v2456_v19 }
 0x88e   : > { %2525 = vmatpush.msra.mxu1 %v2459_v38  ;;  %2557 = vmatpush.msra.mxu2 %v2454_v56 }
 0x890   : > { %2526 = vmatpush.msra.mxu1 %v2457_v30  ;;  %2558 = vmatpush.msra.mxu2 %v4137_v42 }
 0x892   : > { %2527 = vmatpush.msra.mxu1 %v2455_v22  ;;  %2559 = vmatpush.msra.mxu2 %v4129_v61 }
 0x894   : > { %2528 = vmatpush.msra.mxu1 %v2453_v58  ;;  %2560 = vmatpush.msra.mxu2 %v4121_v2  ;;  %v2477_v2 = vld [vmem:[%s4298_s4 + $0x8] sm:$0xff] }
 0x896   : > { %2529 = vmatpush.msra.mxu1 %v4141_v29  ;;  %2561 = vmatpush.msra.mxu2 %v4113_v44  ;;  %v2478_v44 = vld [vmem:[%s4298_s4 + $0x10] sm:$0xff]  ;;  %v2971_v29 = vld [vmem:[%s3086_s13 + $0x8] sm:$0xff] }
 0x897   : > { %2846 = vmatmul.msk.f32.vlgmr.msra.gmra.mxu2 %vm2498_vm0, %v2476_v10 }
 0x898   : > { %2530 = vmatpush.msra.mxu1 %v4135_v33  ;;  %v2970_v33 = vld [vmem:[%s3086_s13] sm:$0xff] }
 0x89a   : > { %2531 = vmatpush.msra.mxu1 %v4127_v3 }
 0x89c   : > { %2532 = vmatpush.msra.mxu1 %v4119_v26  ;;  %v2479_v26 = vld [vmem:[%s4298_s4 + $0x18] sm:$0xff] }
 0x89d   : > { %2841 = vmatmul.msk.f32.vlgmr.msra.gmra.mxu1 %vm2498_vm0, %v2476_v10 }
 0x89f   : > { %2847 = vmatmul.msk.f32.gmra.mxu2 %vm2498_vm0, %v2477_v2 }
 0x8a5   : > { %2842 = vmatmul.msk.f32.gmra.mxu1 %vm2498_vm0, %v2477_v2 }
 0x8a7   : > { %2848 = vmatmul.msk.f32.gmra.mxu2 %vm2498_vm0, %v2478_v44 }
 0x8ad   : > { %2843 = vmatmul.msk.f32.gmra.mxu1 %vm2498_vm0, %v2478_v44 }
 0x8af   : > { %2849 = vmatmul.msk.f32.gmra.mxu2 %vm2498_vm0, %v2479_v26 }
 0x8b5   : > { %2844 = vmatmul.msk.f32.gmra.mxu1 %vm2498_vm0, %v2479_v26 }
 0x91a   : > { %v2534_v3 = vpop.f32.mrf.mxu1  ;;  %v2563_v61 = vpop.f32.mrf.mxu2 }
 0x91b   : > { %v2575_v42 = vadd.f32 %v2970_v33, %v2534_v3  ;;  %v2576_v15 = vadd.f32 %v2971_v29, %v2563_v61 }
 0x91d   : > { %2583 = vst [vmem:[%s4253_s8] sm:$0xff] %v2575_v42 }
 0x91e   : > { %2584 = vst [vmem:[%s4253_s8 + $0x8] sm:$0xff] %v2576_v15 }
 0x922   : > { %v2537_v18 = vpop.f32.mrf.mxu1  ;;  %v2566_v60 = vpop.f32.mrf.mxu2 }
 0x923   : > { %v2577_v43 = vadd.f32 %v2972_v39, %v2537_v18  ;;  %v2578_v16 = vadd.f32 %v2973_v52, %v2566_v60 }
 0x924   : > { %v2613_v49 = vld [vmem:[%s4253_s8] sm:$0xff] (%p3063_p5) }
 0x925   : > { %2585 = vst [vmem:[%s4253_s8 + $0x10] sm:$0xff] %v2577_v43  ;;  %v2615_v37 = vld [vmem:[%s4253_s8 + $0x8] sm:$0xff] (%p3063_p5) }
 0x926   : > { %2586 = vst [vmem:[%s4253_s8 + $0x18] sm:$0xff] %v2578_v16 }
 0x927   : > { %2614 = vst [vmem:[%s2600_s10] sm:$0xff] (%p3063_p5), %v2613_v49 }
 0x928   : > { %2616 = vst [vmem:[%s2600_s10 + $0x8] sm:$0xff] (%p3063_p5), %v2615_v37 }
 0x92a   : > { %v2540_v47 = vpop.f32.mrf.mxu1  ;;  %v2569_v53 = vpop.f32.mrf.mxu2 }
 0x92b   : > { %v2579_v36 = vadd.f32 %v2974_v1, %v2540_v47  ;;  %v2580_v63 = vadd.f32 %v2975_v57, %v2569_v53 }
 0x92c   : > { %v2617_v9 = vld [vmem:[%s4253_s8 + $0x10] sm:$0xff] (%p3063_p5) }
 0x92d   : > { %2587 = vst [vmem:[%s4253_s8 + $0x20] sm:$0xff] %v2579_v36  ;;  %v2619_v62 = vld [vmem:[%s4253_s8 + $0x18] sm:$0xff] (%p3063_p5) }
 0x92e   : > { %2588 = vst [vmem:[%s4253_s8 + $0x28] sm:$0xff] %v2580_v63 }
 0x92f   : > { %2618 = vst [vmem:[%s2600_s10 + $0x20] sm:$0xff] (%p3063_p5), %v2617_v9 }
 0x930   : > { %2620 = vst [vmem:[%s2600_s10 + $0x28] sm:$0xff] (%p3063_p5), %v2619_v62 }
 0x932   : > { %v2543_v51 = vpop.f32.mrf.mxu1  ;;  %v2572_v27 = vpop.f32.mrf.mxu2  ;;  %2597 = sbr.rel (!%p3063_p5) target bundleno = 2367 (0x93f), region = 67 }
 0x933   : > { %v2581_v13 = vadd.f32 %v2976_v41, %v2543_v51  ;;  %v2582_v28 = vadd.f32 %v2977_v35, %v2572_v27 }
 0x934   : > { %v2621_v24 = vld [vmem:[%s4253_s8 + $0x20] sm:$0xff] (%p3063_p5) }
 0x935   : > { %2589 = vst [vmem:[%s4253_s8 + $0x30] sm:$0xff] %v2581_v13  ;;  %v2623_v56 = vld [vmem:[%s4253_s8 + $0x28] sm:$0xff] (%p3063_p5) }
 0x936   : > { %2590 = vst [vmem:[%s4253_s8 + $0x38] sm:$0xff] %v2582_v28 }
 0x937   : > { %2622 = vst [vmem:[%s2600_s10 + $0x40] sm:$0xff] %v2621_v24 }
 0x938   : > { %2624 = vst [vmem:[%s2600_s10 + $0x48] sm:$0xff] %v2623_v56 }
 0x93c   : > { %v2625_v17 = vld [vmem:[%s4253_s8 + $0x30] sm:$0xff] }
 0x93d   : > { %v2627_v7 = vld [vmem:[%s4253_s8 + $0x38] sm:$0xff]  ;;  %2626 = vst [vmem:[%s2600_s10 + $0x60] sm:$0xff] %v2625_v17 }
 0x93e   : > { %2628 = vst [vmem:[%s2600_s10 + $0x68] sm:$0xff] %v2627_v7 }
 0x93f PF: > { %p12_p10 = scmp.ge.s32.totalorder %s3050_s22, 4   ;;  %s4333_s18 = smov %s2996_s19 }
 0x940   : > { %s4334_s19 = smov %s3061_s25  ;;  %s4335_s20 = smov %s3050_s22 }
 0x941   :  { %14 = sbr.rel (!%p12_p10) target bundleno = 2 (0x2), region = 122 }

</bundles_post_ra>
